<compile_context>
chip_gen: v6e
topology: v6e:2x2x1
jax: 0.10.0
libtpu: 0.0.40
codegen_flags: <defaults>
</compile_context>

<pallas_src>
import functools

import jax
import jax.numpy as jnp
from jax.experimental import pallas as pl
from jax.experimental.pallas import tpu as pltpu

D_IN = 28 * 28          # 784
H1 = 256
H2 = 64
D_OUT = 28 * 28         # 784
D_OUT_PAD = 896         # 7 * 128 lane-dense output width

# 128-lane-aligned offsets inside the packed (1, SLAB_W) f32 bias/BN slab.
OFF_B1, OFF_B2, OFF_B3 = 0, 256, 384
OFF_GAMMA, OFF_BETA = 512, 640
OFF_B4, OFF_B5 = 768, 1024
SLAB_W = OFF_B5 + D_OUT_PAD   # 1920


def _round_up(n, m):
    return (n + m - 1) // m * m


def _autoencoder_kernel(x_ref, w1_ref, w2_ref, w3_ref, w4_ref, w5_ref,
                        slab_ref, o_ref, z_ref, sum_ref, ssq_ref,
                        *, bn_eps, true_b, tile_b, need_mask):
    f32 = jnp.float32
    bf16 = jnp.bfloat16
    p = pl.program_id(0)      # 0 = encoder/stats pass, 1 = normalize/decode pass
    i = pl.program_id(1)      # batch-tile index
    row0 = pl.multiple_of(i * tile_b, tile_b)

    @pl.when(p == 0)
    def _encode_and_stats():
        @pl.when(i == 0)
        def _init():
            sum_ref[...] = jnp.zeros_like(sum_ref)
            ssq_ref[...] = jnp.zeros_like(ssq_ref)

        x = x_ref[...]
        h = jnp.dot(x.astype(bf16), w1_ref[...], preferred_element_type=f32)
        h = jnp.maximum(h + slab_ref[:, OFF_B1:OFF_B1 + H1], 0.0)
        h = jnp.dot(h.astype(bf16), w2_ref[...], preferred_element_type=f32)
        h = jnp.maximum(h + slab_ref[:, OFF_B2:OFF_B2 + H2], 0.0)
        z = jnp.dot(h.astype(bf16), w3_ref[...], preferred_element_type=f32)
        z = z + slab_ref[:, OFF_B3:OFF_B3 + H2]

        if need_mask:
            # Zero the contribution of zero-padded tail rows to the batch stats.
            row = jax.lax.broadcasted_iota(jnp.int32, (tile_b, 1), 0) + i * tile_b
            zv = z * (row < true_b).astype(f32)
        else:
            zv = z
        sum_ref[...] += jnp.sum(zv, axis=0, keepdims=True)
        ssq_ref[...] += jnp.sum(zv * zv, axis=0, keepdims=True)
        z_ref[pl.ds(row0, tile_b), :] = z

    @pl.when(p == 1)
    def _normalize_and_decode():
        inv_b = 1.0 / true_b
        mean = sum_ref[...] * inv_b
        var = ssq_ref[...] * inv_b - mean * mean       # biased, torch train mode
        inv_std = jax.lax.rsqrt(var + bn_eps)
        z = z_ref[pl.ds(row0, tile_b), :]
        z = (z - mean) * inv_std
        z = z * slab_ref[:, OFF_GAMMA:OFF_GAMMA + H2] + slab_ref[:, OFF_BETA:OFF_BETA + H2]
        z = jnp.maximum(z, 0.0)
        h = jnp.dot(z.astype(bf16), w4_ref[...], preferred_element_type=f32)
        h = jnp.maximum(h + slab_ref[:, OFF_B4:OFF_B4 + H1], 0.0)
        out = jnp.dot(h.astype(bf16), w5_ref[...], preferred_element_type=f32)
        out = out + slab_ref[:, OFF_B5:OFF_B5 + D_OUT_PAD]
        o_ref[...] = jnp.tanh(out).astype(o_ref.dtype)


def prepare_params(params):
    """One-time parameter prep: bf16 weights, padded w5/b5, packed f32 bias slab.

    params = (w1, b1, w2, b2, w3, b3, gamma, beta, w4, b4, w5, b5), weights
    stored as (in_features, out_features) so the kernel computes x @ W + b
    (== torch's x @ weight.T + bias).
    """
    (w1, b1, w2, b2, w3, b3, gamma, beta, w4, b4, w5, b5) = params
    bf16 = jnp.bfloat16
    w5p = jnp.zeros((H1, D_OUT_PAD), w5.dtype).at[:, :D_OUT].set(w5)
    slab = jnp.zeros((1, SLAB_W), jnp.float32)
    slab = slab.at[0, OFF_B1:OFF_B1 + H1].set(b1.astype(jnp.float32))
    slab = slab.at[0, OFF_B2:OFF_B2 + H2].set(b2.astype(jnp.float32))
    slab = slab.at[0, OFF_B3:OFF_B3 + H2].set(b3.astype(jnp.float32))
    slab = slab.at[0, OFF_GAMMA:OFF_GAMMA + H2].set(gamma.astype(jnp.float32))
    slab = slab.at[0, OFF_BETA:OFF_BETA + H2].set(beta.astype(jnp.float32))
    slab = slab.at[0, OFF_B4:OFF_B4 + H1].set(b4.astype(jnp.float32))
    slab = slab.at[0, OFF_B5:OFF_B5 + D_OUT].set(b5.astype(jnp.float32))
    return (w1.astype(bf16), w2.astype(bf16), w3.astype(bf16),
            w4.astype(bf16), w5p.astype(bf16), slab)


def mnist_autoencoder_forward(x, prepared, *, bn_eps=1e-5, tile_b=512):
    """x: (B, 784) float array; prepared: output of prepare_params."""
    w1, w2, w3, w4, w5, slab = prepared
    B = x.shape[0]
    tile_b = min(tile_b, _round_up(B, 8))
    n_tiles = pl.cdiv(B, tile_b)
    b_pad = n_tiles * tile_b
    if b_pad != B:
        x = jnp.zeros((b_pad, D_IN), x.dtype).at[:B].set(x)

    kernel = functools.partial(
        _autoencoder_kernel, bn_eps=bn_eps, true_b=B, tile_b=tile_b,
        need_mask=(b_pad != B))

    const = lambda p, i: (0, 0)          # weights / slab stay resident in VMEM
    w_elems = D_IN * H1 + H1 * H2 + H2 * H2 + H2 * H1 + H1 * D_OUT_PAD
    cost = pl.CostEstimate(
        flops=2 * b_pad * w_elems,
        transcendentals=b_pad * D_OUT_PAD + H2,
        bytes_accessed=(b_pad * D_IN * 4 + b_pad * D_OUT_PAD * 4
                        + w_elems * 2 + SLAB_W * 4))

    out = pl.pallas_call(
        kernel,
        out_shape=jax.ShapeDtypeStruct((b_pad, D_OUT_PAD), x.dtype),
        grid_spec=pltpu.PrefetchScalarGridSpec(
            num_scalar_prefetch=0,
            grid=(2, n_tiles),           # (pass, batch tile); pass 0 runs first
            in_specs=[
                # x: streamed per batch tile in pass 0; pinned to tile 0 in pass 1.
                pl.BlockSpec((tile_b, D_IN), lambda p, i: (i * (1 - p), 0)),
                pl.BlockSpec((D_IN, H1), const),
                pl.BlockSpec((H1, H2), const),
                pl.BlockSpec((H2, H2), const),
                pl.BlockSpec((H2, H1), const),
                pl.BlockSpec((H1, D_OUT_PAD), const),
                pl.BlockSpec((1, SLAB_W), const),
            ],
            # Constant block index during pass 0 (never written) avoids garbage
            # writebacks; each output tile is written exactly once in pass 1.
            out_specs=pl.BlockSpec((tile_b, D_OUT_PAD), lambda p, i: (i * p, 0)),
            scratch_shapes=[
                pltpu.VMEM((b_pad, H2), jnp.float32),   # z (latent) for full batch
                pltpu.VMEM((1, H2), jnp.float32),       # sum(z)   per feature
                pltpu.VMEM((1, H2), jnp.float32),       # sum(z^2) per feature
            ]),
        compiler_params=pltpu.CompilerParams(
            dimension_semantics=("arbitrary", "arbitrary")),
        cost_estimate=cost,
    )(x, w1, w2, w3, w4, w5, slab)
    return out[:B, :D_OUT]


def _xavier_normal(key, fan_in, fan_out):
    std = (2.0 / (fan_in + fan_out)) ** 0.5
    return std * jax.random.normal(key, (fan_in, fan_out), dtype=jnp.float32)


if __name__ == "__main__":
    key = jax.random.PRNGKey(0)
    kx, k1, k2, k3, k4, k5 = jax.random.split(key, 6)

    B = 8
    x = jax.random.normal(kx, (B, D_IN), dtype=jnp.float32)

    w1 = _xavier_normal(k1, D_IN, H1); b1 = jnp.zeros((H1,), jnp.float32)
    w2 = _xavier_normal(k2, H1, H2);   b2 = jnp.zeros((H2,), jnp.float32)
    w3 = _xavier_normal(k3, H2, H2);   b3 = jnp.zeros((H2,), jnp.float32)
    gamma = jnp.ones((H2,), jnp.float32)
    beta = jnp.zeros((H2,), jnp.float32)
    w4 = _xavier_normal(k4, H2, H1);   b4 = jnp.zeros((H1,), jnp.float32)
    w5 = _xavier_normal(k5, H1, D_OUT); b5 = jnp.zeros((D_OUT,), jnp.float32)
    raw_params = (w1, b1, w2, b2, w3, b3, gamma, beta, w4, b4, w5, b5)

    prepared = prepare_params(raw_params)          # bf16 weights, packed biases
    out = mnist_autoencoder_forward(x, prepared)
    out = jax.block_until_ready(out)

    # Pure-JAX reference using the SAME bf16 weight quantization as the kernel
    # (bf16 weights are a deliberate perf choice; parity with a strict-f32 torch
    # model would be ~1e-2 relative instead).
    bf16, f32 = jnp.bfloat16, jnp.float32

    def ref_forward(x):
        def mm(a, w):
            return jnp.dot(a.astype(bf16), w.astype(bf16), preferred_element_type=f32)
        h = jnp.maximum(mm(x, w1) + b1, 0.0)
        h = jnp.maximum(mm(h, w2) + b2, 0.0)
        z = mm(h, w3) + b3
        m = jnp.mean(z, axis=0, keepdims=True)
        v = jnp.mean(jnp.square(z - m), axis=0, keepdims=True)
        z = (z - m) * jax.lax.rsqrt(v + 1e-5) * gamma + beta
        z = jnp.maximum(z, 0.0)
        h = jnp.maximum(mm(z, w4) + b4, 0.0)
        return jnp.tanh(mm(h, w5) + b5)

    ref = ref_forward(x)
    assert out.shape == (B, D_OUT), out.shape
    max_err = float(jnp.max(jnp.abs(out - ref)))
    assert jnp.allclose(out, ref, atol=5e-3, rtol=5e-3), max_err

    print("KERNEL_OK")
</pallas_src>

<mosaic_0001>
module attributes {stable_mosaic.version = 11 : i64} {
  func.func @_autoencoder_kernel(%arg0: i32, %arg1: i32, %arg2: memref<8x784xf32, #tpu.memory_space<vmem>>, %arg3: memref<784x256xbf16, #tpu.memory_space<vmem>>, %arg4: memref<256x64xbf16, #tpu.memory_space<vmem>>, %arg5: memref<64x64xbf16, #tpu.memory_space<vmem>>, %arg6: memref<64x256xbf16, #tpu.memory_space<vmem>>, %arg7: memref<256x896xbf16, #tpu.memory_space<vmem>>, %arg8: memref<1x1920xf32, #tpu.memory_space<vmem>>, %arg9: memref<8x896xf32, #tpu.memory_space<vmem>>, %arg10: memref<8x64xf32, #tpu.memory_space<vmem>>, %arg11: memref<1x64xf32, #tpu.memory_space<vmem>>, %arg12: memref<1x64xf32, #tpu.memory_space<vmem>>) attributes {dimension_semantics = [#tpu.dimension_semantics<arbitrary>, #tpu.dimension_semantics<arbitrary>], iteration_bounds = array<i64: 2, 1>, scalar_prefetch = 0 : i64, scratch_operands = 3 : i64, tpu.core_type = #tpu.core_type<tc>, window_params = [{transform_indices = @transform_0, window_bounds = array<i64: 8, 784>}, {pipeline_mode = #tpu.pipeline_mode<synchronous>, transform_indices = @transform_1, window_bounds = array<i64: 784, 256>}, {pipeline_mode = #tpu.pipeline_mode<synchronous>, transform_indices = @transform_2, window_bounds = array<i64: 256, 64>}, {pipeline_mode = #tpu.pipeline_mode<synchronous>, transform_indices = @transform_3, window_bounds = array<i64: 64, 64>}, {pipeline_mode = #tpu.pipeline_mode<synchronous>, transform_indices = @transform_4, window_bounds = array<i64: 64, 256>}, {pipeline_mode = #tpu.pipeline_mode<synchronous>, transform_indices = @transform_5, window_bounds = array<i64: 256, 896>}, {pipeline_mode = #tpu.pipeline_mode<synchronous>, transform_indices = @transform_6, window_bounds = array<i64: 1, 1920>}, {transform_indices = @transform_7, window_bounds = array<i64: 8, 896>}]} {
    %c8_i32 = arith.constant 8 : i32
    %0 = arith.muli %arg1, %c8_i32 : i32
    %1 = tpu.assume_multiple %0, 8 : i32
    %c0_i32 = arith.constant 0 : i32
    %2 = arith.cmpi eq, %arg0, %c0_i32 : i32
    %3 = arith.extui %2 : i1 to i32
    %c0_i32_0 = arith.constant 0 : i32
    %4 = arith.cmpi ne, %3, %c0_i32_0 : i32
    scf.if %4 {
      %c0_i32_2 = arith.constant 0 : i32
      %8 = arith.cmpi eq, %arg1, %c0_i32_2 : i32
      %9 = arith.extui %8 : i1 to i32
      %c0_i32_3 = arith.constant 0 : i32
      %10 = arith.cmpi ne, %9, %c0_i32_3 : i32
      scf.if %10 {
        %cst_30 = arith.constant 0.000000e+00 : f32
        %47 = vector.broadcast %cst_30 : f32 to vector<1x64xf32>
        %c0_31 = arith.constant 0 : index
        %c0_32 = arith.constant 0 : index
        %48 = vector.load %arg11[%c0_31, %c0_32] : memref<1x64xf32, #tpu.memory_space<vmem>>, vector<1x64xf32>
        tpu.vector_store %arg11[%c0_31, %c0_32], %47 {strides = array<i32>} : memref<1x64xf32, #tpu.memory_space<vmem>>, vector<1x64xf32>,
        %cst_33 = arith.constant 0.000000e+00 : f32
        %49 = vector.broadcast %cst_33 : f32 to vector<1x64xf32>
        %c0_34 = arith.constant 0 : index
        %c0_35 = arith.constant 0 : index
        %50 = vector.load %arg12[%c0_34, %c0_35] : memref<1x64xf32, #tpu.memory_space<vmem>>, vector<1x64xf32>
        tpu.vector_store %arg12[%c0_34, %c0_35], %49 {strides = array<i32>} : memref<1x64xf32, #tpu.memory_space<vmem>>, vector<1x64xf32>,
      } else {
      }
      %c0 = arith.constant 0 : index
      %c0_4 = arith.constant 0 : index
      %11 = vector.load %arg2[%c0, %c0_4] : memref<8x784xf32, #tpu.memory_space<vmem>>, vector<8x784xf32>
      %12 = arith.truncf %11 : vector<8x784xf32> to vector<8x784xbf16>
      %c0_5 = arith.constant 0 : index
      %c0_6 = arith.constant 0 : index
      %13 = vector.load %arg3[%c0_5, %c0_6] : memref<784x256xbf16, #tpu.memory_space<vmem>>, vector<784x256xbf16>
      %cst = arith.constant dense<0.000000e+00> : vector<8x256xf32>
      %14 = tpu.matmul %12, %13, %cst {dimension_numbers = #tpu.dot_dimension_numbers<[1], [0], [0], [1], [0, 0, 1, 1], [], []>} : vector<8x784xbf16>, vector<784x256xbf16>, vector<8x256xf32> -> vector<8x256xf32>
      %c0_7 = arith.constant 0 : index
      %c0_8 = arith.constant 0 : index
      %15 = vector.load %arg8[%c0_7, %c0_8] : memref<1x1920xf32, #tpu.memory_space<vmem>>, vector<1x256xf32>
      %16 = vector.broadcast %15 : vector<1x256xf32> to vector<8x256xf32>
      %17 = arith.addf %14, %16 : vector<8x256xf32>
      %cst_9 = arith.constant 0.000000e+00 : f32
      %18 = vector.broadcast %cst_9 : f32 to vector<8x256xf32>
      %19 = arith.maximumf %17, %18 : vector<8x256xf32>
      %20 = arith.truncf %19 : vector<8x256xf32> to vector<8x256xbf16>
      %c0_10 = arith.constant 0 : index
      %c0_11 = arith.constant 0 : index
      %21 = vector.load %arg4[%c0_10, %c0_11] : memref<256x64xbf16, #tpu.memory_space<vmem>>, vector<256x64xbf16>
      %cst_12 = arith.constant dense<0.000000e+00> : vector<8x64xf32>
      %22 = tpu.matmul %20, %21, %cst_12 {dimension_numbers = #tpu.dot_dimension_numbers<[1], [0], [0], [1], [0, 0, 1, 1], [], []>} : vector<8x256xbf16>, vector<256x64xbf16>, vector<8x64xf32> -> vector<8x64xf32>
      %c0_13 = arith.constant 0 : index
      %c256 = arith.constant 256 : index
      %23 = vector.load %arg8[%c0_13, %c256] : memref<1x1920xf32, #tpu.memory_space<vmem>>, vector<1x64xf32>
      %24 = vector.broadcast %23 : vector<1x64xf32> to vector<8x64xf32>
      %25 = arith.addf %22, %24 : vector<8x64xf32>
      %cst_14 = arith.constant 0.000000e+00 : f32
      %26 = vector.broadcast %cst_14 : f32 to vector<8x64xf32>
      %27 = arith.maximumf %25, %26 : vector<8x64xf32>
      %28 = arith.truncf %27 : vector<8x64xf32> to vector<8x64xbf16>
      %c0_15 = arith.constant 0 : index
      %c0_16 = arith.constant 0 : index
      %29 = vector.load %arg5[%c0_15, %c0_16] : memref<64x64xbf16, #tpu.memory_space<vmem>>, vector<64x64xbf16>
      %cst_17 = arith.constant dense<0.000000e+00> : vector<8x64xf32>
      %30 = tpu.matmul %28, %29, %cst_17 {dimension_numbers = #tpu.dot_dimension_numbers<[1], [0], [0], [1], [0, 0, 1, 1], [], []>} : vector<8x64xbf16>, vector<64x64xbf16>, vector<8x64xf32> -> vector<8x64xf32>
      %c0_18 = arith.constant 0 : index
      %c384 = arith.constant 384 : index
      %31 = vector.load %arg8[%c0_18, %c384] : memref<1x1920xf32, #tpu.memory_space<vmem>>, vector<1x64xf32>
      %32 = vector.broadcast %31 : vector<1x64xf32> to vector<8x64xf32>
      %33 = arith.addf %30, %32 : vector<8x64xf32>
      %c0_19 = arith.constant 0 : index
      %c0_20 = arith.constant 0 : index
      %34 = vector.load %arg11[%c0_19, %c0_20] : memref<1x64xf32, #tpu.memory_space<vmem>>, vector<1x64xf32>
      %cst_21 = arith.constant dense<0.000000e+00> : vector<64xf32>
      %35 = vector.multi_reduction <add>, %33, %cst_21 [0] : vector<8x64xf32> to vector<64xf32>
      %36 = vector.shape_cast %35 : vector<64xf32> to vector<1x64xf32>
      %37 = arith.addf %34, %36 : vector<1x64xf32>
      %c0_22 = arith.constant 0 : index
      %c0_23 = arith.constant 0 : index
      %38 = vector.load %arg11[%c0_22, %c0_23] : memref<1x64xf32, #tpu.memory_space<vmem>>, vector<1x64xf32>
      tpu.vector_store %arg11[%c0_22, %c0_23], %37 {strides = array<i32>} : memref<1x64xf32, #tpu.memory_space<vmem>>, vector<1x64xf32>,
      %c0_24 = arith.constant 0 : index
      %c0_25 = arith.constant 0 : index
      %39 = vector.load %arg12[%c0_24, %c0_25] : memref<1x64xf32, #tpu.memory_space<vmem>>, vector<1x64xf32>
      %40 = arith.mulf %33, %33 : vector<8x64xf32>
      %cst_26 = arith.constant dense<0.000000e+00> : vector<64xf32>
      %41 = vector.multi_reduction <add>, %40, %cst_26 [0] : vector<8x64xf32> to vector<64xf32>
      %42 = vector.shape_cast %41 : vector<64xf32> to vector<1x64xf32>
      %43 = arith.addf %39, %42 : vector<1x64xf32>
      %c0_27 = arith.constant 0 : index
      %c0_28 = arith.constant 0 : index
      %44 = vector.load %arg12[%c0_27, %c0_28] : memref<1x64xf32, #tpu.memory_space<vmem>>, vector<1x64xf32>
      tpu.vector_store %arg12[%c0_27, %c0_28], %43 {strides = array<i32>} : memref<1x64xf32, #tpu.memory_space<vmem>>, vector<1x64xf32>,
      %45 = arith.index_cast %1 : i32 to index
      %c0_29 = arith.constant 0 : index
      %46 = vector.load %arg10[%45, %c0_29] : memref<8x64xf32, #tpu.memory_space<vmem>>, vector<8x64xf32>
      tpu.vector_store %arg10[%45, %c0_29], %33 {strides = array<i32>} : memref<8x64xf32, #tpu.memory_space<vmem>>, vector<8x64xf32>,
    } else {
    }
    %c1_i32 = arith.constant 1 : i32
    %5 = arith.cmpi eq, %arg0, %c1_i32 : i32
    %6 = arith.extui %5 : i1 to i32
    %c0_i32_1 = arith.constant 0 : i32
    %7 = arith.cmpi ne, %6, %c0_i32_1 : i32
    scf.if %7 {
      %c0 = arith.constant 0 : index
      %c0_2 = arith.constant 0 : index
      %8 = vector.load %arg11[%c0, %c0_2] : memref<1x64xf32, #tpu.memory_space<vmem>>, vector<1x64xf32>
      %cst = arith.constant 1.250000e-01 : f32
      %9 = vector.broadcast %cst : f32 to vector<1x64xf32>
      %10 = arith.mulf %8, %9 : vector<1x64xf32>
      %c0_3 = arith.constant 0 : index
      %c0_4 = arith.constant 0 : index
      %11 = vector.load %arg12[%c0_3, %c0_4] : memref<1x64xf32, #tpu.memory_space<vmem>>, vector<1x64xf32>
      %cst_5 = arith.constant 1.250000e-01 : f32
      %12 = vector.broadcast %cst_5 : f32 to vector<1x64xf32>
      %13 = arith.mulf %11, %12 : vector<1x64xf32>
      %14 = arith.mulf %10, %10 : vector<1x64xf32>
      %15 = arith.subf %13, %14 : vector<1x64xf32>
      %cst_6 = arith.constant 9.99999974E-6 : f32
      %16 = vector.broadcast %cst_6 : f32 to vector<1x64xf32>
      %17 = arith.addf %15, %16 : vector<1x64xf32>
      %18 = math.rsqrt %17 : vector<1x64xf32>
      %19 = arith.index_cast %1 : i32 to index
      %c0_7 = arith.constant 0 : index
      %20 = vector.load %arg10[%19, %c0_7] : memref<8x64xf32, #tpu.memory_space<vmem>>, vector<8x64xf32>
      %21 = vector.broadcast %10 : vector<1x64xf32> to vector<8x64xf32>
      %22 = arith.subf %20, %21 : vector<8x64xf32>
      %23 = vector.broadcast %18 : vector<1x64xf32> to vector<8x64xf32>
      %24 = arith.mulf %22, %23 : vector<8x64xf32>
      %c0_8 = arith.constant 0 : index
      %c512 = arith.constant 512 : index
      %25 = vector.load %arg8[%c0_8, %c512] : memref<1x1920xf32, #tpu.memory_space<vmem>>, vector<1x64xf32>
      %26 = vector.broadcast %25 : vector<1x64xf32> to vector<8x64xf32>
      %27 = arith.mulf %24, %26 : vector<8x64xf32>
      %c0_9 = arith.constant 0 : index
      %c640 = arith.constant 640 : index
      %28 = vector.load %arg8[%c0_9, %c640] : memref<1x1920xf32, #tpu.memory_space<vmem>>, vector<1x64xf32>
      %29 = vector.broadcast %28 : vector<1x64xf32> to vector<8x64xf32>
      %30 = arith.addf %27, %29 : vector<8x64xf32>
      %cst_10 = arith.constant 0.000000e+00 : f32
      %31 = vector.broadcast %cst_10 : f32 to vector<8x64xf32>
      %32 = arith.maximumf %30, %31 : vector<8x64xf32>
      %33 = arith.truncf %32 : vector<8x64xf32> to vector<8x64xbf16>
      %c0_11 = arith.constant 0 : index
      %c0_12 = arith.constant 0 : index
      %34 = vector.load %arg6[%c0_11, %c0_12] : memref<64x256xbf16, #tpu.memory_space<vmem>>, vector<64x256xbf16>
      %cst_13 = arith.constant dense<0.000000e+00> : vector<8x256xf32>
      %35 = tpu.matmul %33, %34, %cst_13 {dimension_numbers = #tpu.dot_dimension_numbers<[1], [0], [0], [1], [0, 0, 1, 1], [], []>} : vector<8x64xbf16>, vector<64x256xbf16>, vector<8x256xf32> -> vector<8x256xf32>
      %c0_14 = arith.constant 0 : index
      %c768 = arith.constant 768 : index
      %36 = vector.load %arg8[%c0_14, %c768] : memref<1x1920xf32, #tpu.memory_space<vmem>>, vector<1x256xf32>
      %37 = vector.broadcast %36 : vector<1x256xf32> to vector<8x256xf32>
      %38 = arith.addf %35, %37 : vector<8x256xf32>
      %cst_15 = arith.constant 0.000000e+00 : f32
      %39 = vector.broadcast %cst_15 : f32 to vector<8x256xf32>
      %40 = arith.maximumf %38, %39 : vector<8x256xf32>
      %41 = arith.truncf %40 : vector<8x256xf32> to vector<8x256xbf16>
      %c0_16 = arith.constant 0 : index
      %c0_17 = arith.constant 0 : index
      %42 = vector.load %arg7[%c0_16, %c0_17] : memref<256x896xbf16, #tpu.memory_space<vmem>>, vector<256x896xbf16>
      %cst_18 = arith.constant dense<0.000000e+00> : vector<8x896xf32>
      %43 = tpu.matmul %41, %42, %cst_18 {dimension_numbers = #tpu.dot_dimension_numbers<[1], [0], [0], [1], [0, 0, 1, 1], [], []>} : vector<8x256xbf16>, vector<256x896xbf16>, vector<8x896xf32> -> vector<8x896xf32>
      %c0_19 = arith.constant 0 : index
      %c1024 = arith.constant 1024 : index
      %44 = vector.load %arg8[%c0_19, %c1024] : memref<1x1920xf32, #tpu.memory_space<vmem>>, vector<1x896xf32>
      %45 = vector.broadcast %44 : vector<1x896xf32> to vector<8x896xf32>
      %46 = arith.addf %43, %45 : vector<8x896xf32>
      %47 = math.tanh %46 : vector<8x896xf32>
      %c0_20 = arith.constant 0 : index
      %c0_21 = arith.constant 0 : index
      %48 = vector.load %arg9[%c0_20, %c0_21] : memref<8x896xf32, #tpu.memory_space<vmem>>, vector<8x896xf32>
      tpu.vector_store %arg9[%c0_20, %c0_21], %47 {strides = array<i32>} : memref<8x896xf32, #tpu.memory_space<vmem>>, vector<8x896xf32>,
    } else {
    }
    return
  }
  func.func @transform_0(%arg0: i32, %arg1: i32) -> (i32, i32) {
    %c1_i32 = arith.constant 1 : i32
    %0 = arith.subi %c1_i32, %arg0 : i32
    %1 = arith.muli %arg1, %0 : i32
    %c0_i32 = arith.constant 0 : i32
    %c0_i32_0 = arith.constant 0 : i32
    return %1, %c0_i32 : i32, i32
  }
  func.func @transform_1(%arg0: i32, %arg1: i32) -> (i32, i32) {
    %c0_i32 = arith.constant 0 : i32
    %c0_i32_0 = arith.constant 0 : i32
    %c0_i32_1 = arith.constant 0 : i32
    return %c0_i32, %c0_i32_0 : i32, i32
  }
  func.func @transform_2(%arg0: i32, %arg1: i32) -> (i32, i32) {
    %c0_i32 = arith.constant 0 : i32
    %c0_i32_0 = arith.constant 0 : i32
    %c0_i32_1 = arith.constant 0 : i32
    return %c0_i32, %c0_i32_0 : i32, i32
  }
  func.func @transform_3(%arg0: i32, %arg1: i32) -> (i32, i32) {
    %c0_i32 = arith.constant 0 : i32
    %c0_i32_0 = arith.constant 0 : i32
    %c0_i32_1 = arith.constant 0 : i32
    return %c0_i32, %c0_i32_0 : i32, i32
  }
  func.func @transform_4(%arg0: i32, %arg1: i32) -> (i32, i32) {
    %c0_i32 = arith.constant 0 : i32
    %c0_i32_0 = arith.constant 0 : i32
    %c0_i32_1 = arith.constant 0 : i32
    return %c0_i32, %c0_i32_0 : i32, i32
  }
  func.func @transform_5(%arg0: i32, %arg1: i32) -> (i32, i32) {
    %c0_i32 = arith.constant 0 : i32
    %c0_i32_0 = arith.constant 0 : i32
    %c0_i32_1 = arith.constant 0 : i32
    return %c0_i32, %c0_i32_0 : i32, i32
  }
  func.func @transform_6(%arg0: i32, %arg1: i32) -> (i32, i32) {
    %c0_i32 = arith.constant 0 : i32
    %c0_i32_0 = arith.constant 0 : i32
    %c0_i32_1 = arith.constant 0 : i32
    return %c0_i32, %c0_i32_0 : i32, i32
  }
  func.func @transform_7(%arg0: i32, %arg1: i32) -> (i32, i32) {
    %0 = arith.muli %arg1, %arg0 : i32
    %c0_i32 = arith.constant 0 : i32
    %c0_i32_0 = arith.constant 0 : i32
    return %0, %c0_i32 : i32, i32
  }
}

</mosaic_0001>

<bundles_post_ra>
// kernel: tpu_custom_call.1
= control target key start
LH: loop header
LB: loop body
LE: loop exit
PB: predicated region body
PF: predicated region fallthrough
CT: control target
= control target key end

     0   :  { %12 = vsyncpa [#allocation6], 0  ;;  %s3757_s0 = inlined_call_operand.vmem [shape: f32[8,784], index: 0, kind: input, shape index: {}]   ;;  %s3758_s1 = inlined_call_operand.hbm [shape: bf16[784,256], index: 1, kind: input, shape index: {}]   ;;  %s3759_s2 = inlined_call_operand.vmem [shape: bf16[256,64], index: 2, kind: input, shape index: {}]   ;;  %s3760_s3 = inlined_call_operand.vmem [shape: bf16[64,64], index: 3, kind: input, shape index: {}]   ;;  %s3761_s4 = inlined_call_operand.vmem [shape: bf16[64,256], index: 4, kind: input, shape index: {}]   ;;  %s3762_s5 = inlined_call_operand.hbm [shape: bf16[256,896], index: 5, kind: input, shape index: {}]   ;;  %s3763_s6 = inlined_call_operand.vmem [shape: f32[1,1920], index: 6, kind: input, shape index: {}]   ;;  %s3764_s7 = inlined_call_operand.hbm [shape: f32[8,896], index: 7, kind: output, shape index: {}]  }
   0x1   :  { %13 = vsyncpa [#allocation9], 0 }
   0x2   :  { %14 = vsyncpa [#allocation7], 0 }
   0x3   :  { %16 = vsyncpa [#allocation7 + $0x1], 0  ;;  %s3506_s24 = smov 0   ;;  %s3508_s25 = smov 0  }
   0x4   :  { %s3510_s26 = smov 0  }
   0x5 LB: > { %s2601_s27 = sadd.s32 4294967295, %s3453_s26   ;;  %s2602_s28 = sadd.s32 4294967294, %s3453_s26   ;;  %s3453_s26 = sphi %s3510_s26, %s22_s26   ;;  %s3449_s25 = sphi %s3508_s25, %s3770_s25   ;;  %s3445_s24 = sphi %s3506_s24, %s3769_s24  }
   0x6   : > { %s34_s29 = sadd.s32 1, %s3449_s25  ;;  %p2603_p0 = scmp.ge.s32.totalorder %s3453_s26, 1 }
   0x7   : > { %p36_p1 = scmp.ge.s32.totalorder %s34_s29, 2  ;;  %p223_p2 = scmp.lt.s32.totalorder %s3453_s26, 3 }
   0x8   : > { %p3528_p3 = scmp.eq.s32.totalorder %s2601_s27, 0  ;;  %s3455_s9 = smov [#allocation5]  }
   0x9   : > { %s3772_s29 = smov (%p36_p1, %s34_s29), 0  ;;  %p3534_p4 = pnand %p2603_p0, %p223_p2 }
   0xa   : > { %s235_s10 = sshll.u32 %s3455_s9, 4  ;;  %s3456_s12 = smov [#allocation8]   ;;  %s236_s10 = int_to_ptr.vmem [resolvable:$true] %s235_s10 }
   0xb   : > { %p2935_p5 = pneg %p3534_p4  ;;  %s257_s13 = sshll.u32 %s3456_s12, 4  ;;  %s258_s13 = int_to_ptr.vmem [resolvable:$true] %s257_s13 }
   0xc   : > { %s3354_s14 = scalar_lea.vmem %s236_s10, 12544  ;;  %p3362_p11 = scmp.lt.s32.totalorder %s236_s10, %s236_s10 }
   0xd   : > { %p3542_p6 = pnand %p3528_p3, %p2935_p5  ;;  %p3355_p8 = scmp.ne.s32.totalorder %s236_s10, %s3354_s14 }
   0xe   : > { %p3363_p12 = scmp.lt.s32.totalorder %s3354_s14, %s3354_s14 }
   0xf   : > { %p3345_p7 = pneg %p3542_p6 }
  0x10   : > { %p3364_p13 = por %p3363_p12, %p3362_p11 }
  0x11   : > { %p3357_p9 = pnand %p3355_p8, %p3345_p7 }
  0x13   : > { %p3358_p10 = pneg %p3357_p9 }
  0x15   : > { %p3365_p0 = pnand %p3364_p13, %p3358_p10 }
  0x17   : > { %3368 = shalt.err (!%p3365_p0)
}
  0x18   : > { %s3457_s15 = smov 128   ;;  %s3458_s16 = smov 8  }
  0x19   : > { %2938 = dma.hbm_to_vmem [thread:$0]  (!%p3542_p6), %s3758_s1, 12544, %s236_s10, [#allocation6], %s3457_s15, %s3457_s15, %s3458_s16  }
  0x1a   : > { %s3380_s19 = scalar_lea.vmem %s258_s13, 14336  ;;  %p3388_p8 = scmp.lt.s32.totalorder %s258_s13, %s258_s13 }
  0x1b   : > { %p3381_p1 = scmp.ne.s32.totalorder %s258_s13, %s3380_s19  ;;  %p3389_p9 = scmp.lt.s32.totalorder %s3380_s19, %s3380_s19 }
  0x1d   : > { %p3383_p2 = pnand %p3381_p1, %p3345_p7  ;;  %p3390_p11 = por %p3389_p9, %p3388_p8 }
  0x1f   : > { %p3384_p5 = pneg %p3383_p2 }
  0x21   : > { %p3391_p10 = pnand %p3390_p11, %p3384_p5 }
  0x23   : > { %3394 = shalt.err (!%p3391_p10)
}
  0x24   : > { %s3459_s20 = smov 448   ;;  %s3460_s21 = smov 28  }
  0x25   : > { %2941 = dma.hbm_to_vmem [thread:$0]  (!%p3542_p6), %s3762_s5, 14336, %s258_s13, [#allocation9], %s3459_s20, %s3459_s20, %s3460_s21  }
  0x26   : > { %288 = sbr.rel (%p3534_p4) target bundleno = 1337 (0x539), region = 48 }
  0x2b   : > { %3432 = dma.done.wait (%p3528_p3), [#allocation6], 12544  }
  0x2c   : > { %3434 = vsyncadd (%p3528_p3), [#allocation6], 4294954752 }
  0x2d   : > { %3436 = dma.done.wait (%p3528_p3), [#allocation9], 14336  }
  0x2e   : > { %3438 = vsyncadd (%p3528_p3), [#allocation9], 4294952960  ;;  %p2611_p7 = scmp.ne.s32.totalorder %s3445_s24, 0 }
  0x30   : > { %341 = sbr.rel (%p2611_p7) target bundleno = 802 (0x322), region = 60 }
  0x35   : > { %v2988_v0 = vld [vmem:[#allocation5 + $0x74] ss:$8 sps:$4 sm:$0xff]   ;;  %v2990_v1 = vld [vmem:[#allocation5 + $0x70] ss:$8 sps:$4 sm:$0xff]   ;;  %v2994_v4 = vld [vmem:[#allocation5 + $0x64] ss:$8 sps:$4 sm:$0xff]  }
  0x36   : > { %967 = vmatprep.subr.bf16.mxu0 %v2988_v0  ;;  %v2991_v2 = vld [vmem:[#allocation5 + $0x174] ss:$8 sps:$4 sm:$0xff]   ;;  %v2993_v3 = vld [vmem:[#allocation5 + $0x170] ss:$8 sps:$4 sm:$0xff]   ;;  %v2996_v5 = vld [vmem:[#allocation5 + $0x60] ss:$8 sps:$4 sm:$0xff]  }
  0x37   : > { %968 = vmatpush1.bf16.msra.mxu0 %v2990_v1  ;;  %1008 = vmatprep.subr.bf16.mxu1 %v2991_v2  ;;  %v2997_v6 = vld [vmem:[#allocation5 + $0x164] ss:$8 sps:$4 sm:$0xff]   ;;  %v2999_v7 = vld [vmem:[#allocation5 + $0x160] ss:$8 sps:$4 sm:$0xff]   ;;  %v3000_v8 = vld [vmem:[#allocation5 + $0x54] ss:$8 sps:$4 sm:$0xff]  }
  0x38   : > { %1009 = vmatpush1.bf16.msra.mxu1 %v2993_v3  ;;  %969 = vmatprep.subr.bf16.mxu0 %v2994_v4  ;;  %v3002_v9 = vld [vmem:[#allocation5 + $0x50] ss:$8 sps:$4 sm:$0xff]   ;;  %v3003_v10 = vld [vmem:[#allocation5 + $0x154] ss:$8 sps:$4 sm:$0xff]   ;;  %v3006_v11 = vld [vmem:[#allocation5 + $0x44] ss:$8 sps:$4 sm:$0xff]  }
  0x39   : > { %1010 = vmatprep.subr.bf16.mxu1 %v2997_v6  ;;  %v3005_v12 = vld [vmem:[#allocation5 + $0x150] ss:$8 sps:$4 sm:$0xff]   ;;  %v3009_v13 = vld [vmem:[#allocation5 + $0x144] ss:$8 sps:$4 sm:$0xff]   ;;  %v3008_v14 = vld [vmem:[#allocation5 + $0x40] ss:$8 sps:$4 sm:$0xff]  }
  0x3a   : > { %v3012_v15 = vld [vmem:[#allocation5 + $0x34] ss:$8 sps:$4 sm:$0xff]   ;;  %v3011_v16 = vld [vmem:[#allocation5 + $0x140] ss:$8 sps:$4 sm:$0xff]   ;;  %v3014_v18 = vld [vmem:[#allocation5 + $0x30] ss:$8 sps:$4 sm:$0xff]  }
  0x3b   : > { %970 = vmatpush1.bf16.msra.mxu0 %v2996_v5  ;;  %v3015_v17 = vld [vmem:[#allocation5 + $0x134] ss:$8 sps:$4 sm:$0xff]   ;;  %v3018_v19 = vld [vmem:[#allocation5 + $0x24] ss:$8 sps:$4 sm:$0xff]   ;;  %v3017_v20 = vld [vmem:[#allocation5 + $0x130] ss:$8 sps:$4 sm:$0xff]  }
  0x3c   : > { %971 = vmatprep.subr.bf16.mxu0 %v3000_v8  ;;  %1011 = vmatpush1.bf16.msra.mxu1 %v2999_v7  ;;  %v3021_v21 = vld [vmem:[#allocation5 + $0x124] ss:$8 sps:$4 sm:$0xff]   ;;  %v3020_v22 = vld [vmem:[#allocation5 + $0x20] ss:$8 sps:$4 sm:$0xff]   ;;  %v3024_v23 = vld [vmem:[#allocation5 + $0x14] ss:$8 sps:$4 sm:$0xff]  }
  0x3d   : > { %1012 = vmatprep.subr.bf16.mxu1 %v3003_v10  ;;  %v3023_v24 = vld [vmem:[#allocation5 + $0x120] ss:$8 sps:$4 sm:$0xff]   ;;  %v3027_v25 = vld [vmem:[#allocation5 + $0x114] ss:$8 sps:$4 sm:$0xff]   ;;  %v3026_v26 = vld [vmem:[#allocation5 + $0x10] ss:$8 sps:$4 sm:$0xff]  }
  0x3e   : > { %v3030_v27 = vld [vmem:[#allocation5 + $0x4] ss:$8 sps:$4 sm:$0xff]   ;;  %v3029_v28 = vld [vmem:[#allocation5 + $0x110] ss:$8 sps:$4 sm:$0xff]   ;;  %v3032_v30 = vld [vmem:[#allocation5] ss:$8 sps:$4 sm:$0xff]  }
  0x3f   : > { %972 = vmatpush1.bf16.msra.mxu0 %v3002_v9  ;;  %v3033_v29 = vld [vmem:[#allocation5 + $0x104] ss:$8 sps:$4 sm:$0xff]   ;;  %v3036_v31 = vld [vmem:[#allocation5 + $0xf4] ss:$8 sps:$4 sm:$0xff]   ;;  %v3035_v32 = vld [vmem:[#allocation5 + $0x100] ss:$8 sps:$4 sm:$0xff]  }
  0x40   : > { %973 = vmatprep.subr.bf16.mxu0 %v3006_v11  ;;  %1013 = vmatpush1.bf16.msra.mxu1 %v3005_v12  ;;  %v3039_v33 = vld [vmem:[#allocation5 + $0x1f4] ss:$8 sps:$4 sm:$0xff]   ;;  %v3038_v34 = vld [vmem:[#allocation5 + $0xf0] ss:$8 sps:$4 sm:$0xff]   ;;  %v3042_v35 = vld [vmem:[#allocation5 + $0xe4] ss:$8 sps:$4 sm:$0xff]  }
  0x41   : > { %1014 = vmatprep.subr.bf16.mxu1 %v3009_v13  ;;  %v3041_v36 = vld [vmem:[#allocation5 + $0x1f0] ss:$8 sps:$4 sm:$0xff]   ;;  %v3045_v37 = vld [vmem:[#allocation5 + $0x1e4] ss:$8 sps:$4 sm:$0xff]   ;;  %v3044_v38 = vld [vmem:[#allocation5 + $0xe0] ss:$8 sps:$4 sm:$0xff]  }
  0x42   : > { %v3048_v39 = vld [vmem:[#allocation5 + $0xd4] ss:$8 sps:$4 sm:$0xff]   ;;  %v3047_v40 = vld [vmem:[#allocation5 + $0x1e0] ss:$8 sps:$4 sm:$0xff]   ;;  %v3050_v42 = vld [vmem:[#allocation5 + $0xd0] ss:$8 sps:$4 sm:$0xff]  }
  0x43   : > { %974 = vmatpush1.bf16.msra.mxu0 %v3008_v14  ;;  %v3051_v41 = vld [vmem:[#allocation5 + $0x1d4] ss:$8 sps:$4 sm:$0xff]   ;;  %v3054_v43 = vld [vmem:[#allocation5 + $0xc4] ss:$8 sps:$4 sm:$0xff]   ;;  %v3053_v44 = vld [vmem:[#allocation5 + $0x1d0] ss:$8 sps:$4 sm:$0xff]  }
  0x44   : > { %975 = vmatprep.subr.bf16.mxu0 %v3012_v15  ;;  %1015 = vmatpush1.bf16.msra.mxu1 %v3011_v16  ;;  %v3057_v45 = vld [vmem:[#allocation5 + $0x1c4] ss:$8 sps:$4 sm:$0xff]   ;;  %v3056_v47 = vld [vmem:[#allocation5 + $0xc0] ss:$8 sps:$4 sm:$0xff]   ;;  %v3060_v49 = vld [vmem:[#allocation5 + $0xb4] ss:$8 sps:$4 sm:$0xff]  }
  0x45   : > { %1016 = vmatprep.subr.bf16.mxu1 %v3015_v17  ;;  %v350_v46 = vld [vmem:[%s3757_s0 + $0x8] sm:$0xff]  ;;  %v352_v50 = vld [vmem:[%s3757_s0 + $0x18] sm:$0xff]  ;;  %v349_v4 = vld [vmem:[%s3757_s0] sm:$0xff]  ;;  %vm963_vm0 = vcmask 130048   ;;  %vm3463_vm1 = vmmov 0   ;;  %vm346_vm2 = vcmask 516096  }
  0x46   : > { %v357_v48 = vpack.c.bf16 %v350_v46, %v350_v46  ;;  %v3059_v51 = vld [vmem:[#allocation5 + $0x1c0] ss:$8 sps:$4 sm:$0xff]   ;;  %v359_v52 = vpack.c.bf16 %v352_v50, %v352_v50  ;;  %v3063_v53 = vld [vmem:[#allocation5 + $0x1b4] ss:$8 sps:$4 sm:$0xff]   ;;  %v3062_v54 = vld [vmem:[#allocation5 + $0xb0] ss:$8 sps:$4 sm:$0xff]   ;;  %v356_v7 = vpack.c.bf16 %v349_v4, %v349_v4 }
  0x47   : > { %976 = vmatpush1.bf16.msra.mxu0 %v3014_v18  ;;  %v3066_v55 = vld [vmem:[#allocation5 + $0xa4] ss:$8 sps:$4 sm:$0xff]   ;;  %v3065_v56 = vld [vmem:[#allocation5 + $0x1b0] ss:$8 sps:$4 sm:$0xff]   ;;  %v3068_v58 = vld [vmem:[#allocation5 + $0xa0] ss:$8 sps:$4 sm:$0xff]  }
  0x48   : > { %977 = vmatprep.subr.bf16.mxu0 %v3018_v19  ;;  %1017 = vmatpush1.bf16.msra.mxu1 %v3017_v20  ;;  %v3069_v57 = vld [vmem:[#allocation5 + $0x1a4] ss:$8 sps:$4 sm:$0xff]   ;;  %v3072_v59 = vld [vmem:[#allocation5 + $0x94] ss:$8 sps:$4 sm:$0xff]   ;;  %v3071_v60 = vld [vmem:[#allocation5 + $0x1a0] ss:$8 sps:$4 sm:$0xff]  }
  0x49   : > { %1018 = vmatprep.subr.bf16.mxu1 %v3021_v21  ;;  %999 = vmatprep.mubr.bf16.mxu0 %v357_v48  ;;  %v3075_v61 = vld [vmem:[#allocation5 + $0x194] ss:$8 sps:$4 sm:$0xff]   ;;  %v3074_v62 = vld [vmem:[#allocation5 + $0x90] ss:$8 sps:$4 sm:$0xff]   ;;  %v3078_v63 = vld [vmem:[#allocation5 + $0x84] ss:$8 sps:$4 sm:$0xff]  }
  0x4a   : > { %1040 = vmatprep.mubr.bf16.mxu1 %v359_v52  ;;  %v3077_v0 = vld [vmem:[#allocation5 + $0x190] ss:$8 sps:$4 sm:$0xff]   ;;  %v3080_v1 = vld [vmem:[#allocation5 + $0x80] ss:$8 sps:$4 sm:$0xff]   ;;  %v3081_v2 = vld [vmem:[#allocation5 + $0x184] ss:$8 sps:$4 sm:$0xff]  }
  0x4b   : > { %978 = vmatpush1.bf16.msra.mxu0 %v3020_v22  ;;  %v3083_v3 = vld [vmem:[#allocation5 + $0x180] ss:$8 sps:$4 sm:$0xff]   ;;  %v3086_v5 = vld [vmem:[#allocation5 + $0x274] ss:$8 sps:$4 sm:$0xff]   ;;  %v3084_v8 = vld [vmem:[#allocation5 + $0x270] ss:$8 sps:$4 sm:$0xff]  }
  0x4c   : > { %979 = vmatprep.subr.bf16.mxu0 %v3024_v23  ;;  %1019 = vmatpush1.bf16.msra.mxu1 %v3023_v24  ;;  %v351_v6 = vld [vmem:[%s3757_s0 + $0x10] sm:$0xff]  ;;  %v3092_v14 = vld [vmem:[#allocation5 + $0x254] ss:$8 sps:$4 sm:$0xff]   ;;  %v3090_v18 = vld [vmem:[#allocation5 + $0x250] ss:$8 sps:$4 sm:$0xff]   ;;  %v3461_v19 = vmov 0  }
  0x4d   : > { %1020 = vmatprep.subr.bf16.mxu1 %v3027_v25  ;;  %v3089_v9 = vld [vmem:[#allocation5 + $0x264] ss:$8 sps:$4 sm:$0xff]   ;;  %v358_v10 = vpack.c.bf16 %v351_v6, %v351_v6  ;;  %v3129_v11 = vld [vmem:[#allocation5 + $0x300] ss:$8 sps:$4 sm:$0xff]   ;;  %v3098_v23 = vld [vmem:[#allocation5 + $0x234] ss:$8 sps:$4 sm:$0xff]  }
  0x4e   : > { %v3131_v12 = vld [vmem:[#allocation5 + $0x304] ss:$8 sps:$4 sm:$0xff]   ;;  %v3087_v13 = vld [vmem:[#allocation5 + $0x260] ss:$8 sps:$4 sm:$0xff]   ;;  %v3096_v24 = vld [vmem:[#allocation5 + $0x230] ss:$8 sps:$4 sm:$0xff]  }
  0x4f   : > { %980 = vmatpush1.bf16.msra.mxu0 %v3026_v26  ;;  %v355_v15 = vld [vmem:[%s3757_s0 + $0x30] sm:$0xff]  ;;  %v354_v16 = vld [vmem:[%s3757_s0 + $0x28] sm:$0xff]  ;;  %v3136_v50 = vld [vmem:[%s3759_s2 + $0x38] sm:$0xff]   ;;  %vm1351_vm3 = vcmask 523264  }
  0x50   : > { %981 = vmatprep.subr.bf16.mxu0 %v3030_v27  ;;  %1021 = vmatpush1.bf16.msra.mxu1 %v3029_v28  ;;  %v361_v17 = vpack.c.bf16 %v354_v16, %v354_v16  ;;  %v3095_v20 = vld [vmem:[#allocation5 + $0x244] ss:$8 sps:$4 sm:$0xff]   ;;  %v362_v21 = vpack.c.bf16 %v355_v15, %v355_v15  ;;  %v3093_v22 = vld [vmem:[#allocation5 + $0x240] ss:$8 sps:$4 sm:$0xff]   ;;  %v3104_v27 = vld [vmem:[#allocation5 + $0x214] ss:$8 sps:$4 sm:$0xff]  }
  0x51   : > { %1022 = vmatprep.subr.bf16.mxu1 %v3033_v29  ;;  %v3101_v25 = vld [vmem:[#allocation5 + $0x224] ss:$8 sps:$4 sm:$0xff]   ;;  %v3099_v26 = vld [vmem:[#allocation5 + $0x220] ss:$8 sps:$4 sm:$0xff]   ;;  %v3102_v28 = vld [vmem:[#allocation5 + $0x210] ss:$8 sps:$4 sm:$0xff]  }
  0x52   : > { %v3107_v29 = vld [vmem:[#allocation5 + $0x204] ss:$8 sps:$4 sm:$0xff]   ;;  %v3132_v46 = vld [vmem:[#allocation5 + $0x280] ss:$8 sps:$4 sm:$0xff]  }
  0x53   : > { %982 = vmatpush1.bf16.msra.mxu0 %v3032_v30  ;;  %v3105_v30 = vld [vmem:[#allocation5 + $0x200] ss:$8 sps:$4 sm:$0xff]  }
  0x54   : > { %983 = vmatprep.subr.bf16.mxu0 %v3036_v31  ;;  %1023 = vmatpush1.bf16.msra.mxu1 %v3035_v32  ;;  %v3110_v31 = vld [vmem:[#allocation5 + $0x2f4] ss:$8 sps:$4 sm:$0xff]   ;;  %v3108_v32 = vld [vmem:[#allocation5 + $0x2f0] ss:$8 sps:$4 sm:$0xff]   ;;  %v3138_v52 = vld [vmem:[%s3759_s2 + $0x30] sm:$0xff]  }
  0x55   : > { %1024 = vmatprep.subr.bf16.mxu1 %v3039_v33  ;;  %v3113_v33 = vld [vmem:[#allocation5 + $0x2e4] ss:$8 sps:$4 sm:$0xff]  }
  0x57   : > { %984 = vmatpush2.bf16.msra.mxu0 %v3038_v34  ;;  %v3111_v34 = vld [vmem:[#allocation5 + $0x2e0] ss:$8 sps:$4 sm:$0xff]  }
  0x58   : > { %985 = vmatprep.subr.bf16.mxu0 %v3042_v35  ;;  %1025 = vmatpush2.bf16.msra.mxu1 %v3041_v36  ;;  %v3116_v35 = vld [vmem:[#allocation5 + $0x2d4] ss:$8 sps:$4 sm:$0xff]   ;;  %v3114_v36 = vld [vmem:[#allocation5 + $0x2d0] ss:$8 sps:$4 sm:$0xff]  }
  0x59   : > { %1026 = vmatprep.subr.bf16.mxu1 %v3045_v37  ;;  %v3119_v37 = vld [vmem:[#allocation5 + $0x2c4] ss:$8 sps:$4 sm:$0xff]  }
  0x5b   : > { %986 = vmatpush2.bf16.msra.mxu0 %v3044_v38  ;;  %v3117_v38 = vld [vmem:[#allocation5 + $0x2c0] ss:$8 sps:$4 sm:$0xff]  }
  0x5c   : > { %987 = vmatprep.subr.bf16.mxu0 %v3048_v39  ;;  %1027 = vmatpush2.bf16.msra.mxu1 %v3047_v40  ;;  %v3122_v39 = vld [vmem:[#allocation5 + $0x2b4] ss:$8 sps:$4 sm:$0xff]   ;;  %v3120_v40 = vld [vmem:[#allocation5 + $0x2b0] ss:$8 sps:$4 sm:$0xff]  }
  0x5d   : > { %1028 = vmatprep.subr.bf16.mxu1 %v3051_v41  ;;  %v3125_v41 = vld [vmem:[#allocation5 + $0x2a4] ss:$8 sps:$4 sm:$0xff]  }
  0x5f   : > { %988 = vmatpush2.bf16.msra.mxu0 %v3050_v42  ;;  %v3123_v42 = vld [vmem:[#allocation5 + $0x2a0] ss:$8 sps:$4 sm:$0xff]  }
  0x60   : > { %989 = vmatprep.subr.bf16.mxu0 %v3054_v43  ;;  %1029 = vmatpush2.bf16.msra.mxu1 %v3053_v44  ;;  %v3128_v43 = vld [vmem:[#allocation5 + $0x294] ss:$8 sps:$4 sm:$0xff]   ;;  %v3126_v44 = vld [vmem:[#allocation5 + $0x290] ss:$8 sps:$4 sm:$0xff]  }
  0x61   : > { %1030 = vmatprep.subr.bf16.mxu1 %v3057_v45  ;;  %v3134_v45 = vld [vmem:[#allocation5 + $0x284] ss:$8 sps:$4 sm:$0xff]  }
  0x63   : > { %990 = vmatpush2.bf16.msra.mxu0 %v3056_v47  ;;  %v353_v47 = vld [vmem:[%s3757_s0 + $0x20] sm:$0xff] }
  0x64   : > { %991 = vmatprep.subr.bf16.mxu0 %v3060_v49  ;;  %1031 = vmatpush2.bf16.msra.mxu1 %v3059_v51  ;;  %v360_v48 = vpack.c.bf16 %v353_v47, %v353_v47  ;;  %v3135_v49 = vld [vmem:[%s3759_s2 + $0x78] sm:$0xff]   ;;  %v3137_v51 = vld [vmem:[%s3759_s2 + $0x70] sm:$0xff]  }
  0x65   : > { %1032 = vmatprep.subr.bf16.mxu1 %v3063_v53  ;;  %v3139_v53 = vld [vmem:[%s3759_s2 + $0x68] sm:$0xff]  }
  0x67   : > { %992 = vmatpush2.bf16.msra.mxu0 %v3062_v54  ;;  %v3140_v54 = vld [vmem:[%s3759_s2 + $0x28] sm:$0xff]  }
  0x68   : > { %993 = vmatprep.subr.bf16.mxu0 %v3066_v55  ;;  %1033 = vmatpush2.bf16.msra.mxu1 %v3065_v56  ;;  %v3141_v55 = vld [vmem:[%s3759_s2 + $0x60] sm:$0xff]  }
  0x69   : > { %1034 = vmatprep.subr.bf16.mxu1 %v3069_v57  ;;  %v3142_v56 = vld [vmem:[%s3759_s2 + $0x20] sm:$0xff]   ;;  %v3143_v57 = vld [vmem:[%s3759_s2 + $0x58] sm:$0xff]  }
  0x6b   : > { %994 = vmatpush2.bf16.msra.mxu0 %v3068_v58  ;;  %v3144_v58 = vld [vmem:[%s3759_s2 + $0x18] sm:$0xff]  }
  0x6c   : > { %995 = vmatprep.subr.bf16.mxu0 %v3072_v59  ;;  %1035 = vmatpush2.bf16.msra.mxu1 %v3071_v60  ;;  %v3145_v59 = vld [vmem:[%s3759_s2 + $0x50] sm:$0xff]  }
  0x6d   : > { %1036 = vmatprep.subr.bf16.mxu1 %v3075_v61  ;;  %v3146_v60 = vld [vmem:[%s3759_s2 + $0x10] sm:$0xff]   ;;  %v3147_v61 = vld [vmem:[%s3759_s2 + $0x48] sm:$0xff]  }
  0x6f   : > { %996 = vmatpush2.bf16.msra.mxu0 %v3074_v62  ;;  %v3148_v62 = vld [vmem:[%s3759_s2 + $0x8] sm:$0xff]  }
  0x70   : > { %997 = vmatprep.subr.bf16.mxu0 %v3078_v63  ;;  %1037 = vmatpush2.bf16.msra.mxu1 %v3077_v0  ;;  %v3149_v63 = vld [vmem:[%s3759_s2 + $0x40] sm:$0xff]  }
  0x71   : > { %1038 = vmatprep.subr.bf16.mxu1 %v3081_v2  ;;  %v3150_v0 = vld [vmem:[%s3759_s2] sm:$0xff]  }
  0x73   : > { %998 = vmatpush2.bf16.msra.mxu0 %v3080_v1  ;;  %v3462_v1 = vmov 0.0  }
  0x74   : > { %1049 = vmatprep.subr.bf16.mxu0 %v3086_v5  ;;  %1039 = vmatpush2.bf16.msra.mxu1 %v3083_v3  ;;  %347 = vst.msk [vmem:[#allocation3] sm:$0x1] %vm346_vm2, %v3462_v1  ;;  %348 = vst.msk [vmem:[#allocation4] sm:$0x1] %vm346_vm2, %v3462_v1 }
  0x75   : > { %1104 = vmatprep.subr.bf16.mxu1 %v3131_v12 }
  0x76   : > { %1000 = vmatmul.mubr.bf16.vlgmr.msra.gmra.mxu0 %v356_v7 }
  0x77   : > { %1050 = vmatpush1.bf16.msra.mxu0 %v3084_v8  ;;  %1041 = vmatmul.mubr.bf16.vlgmr.msra.gmra.mxu1 %v358_v10 }
  0x78   : > { %1051 = vmatprep.subr.bf16.mxu0 %v3089_v9  ;;  %1105 = vmatpush1.bf16.msra.mxu1 %v3129_v11 }
  0x79   : > { %1122 = vmatprep.mubr.bf16.mxu1 %v3461_v19  ;;  %1081 = vmatprep.mubr.bf16.mxu0 %v361_v17  ;;  %v461_v17 = vld [vmem:[%s3763_s6] sm:$0x3] }
  0x7a   : > { %2862 = vmatprep.subr.bf16.mxu1 %v3135_v49 }
  0x7b   : > { %1052 = vmatpush1.bf16.msra.mxu0 %v3087_v13 }
  0x7c   : > { %1053 = vmatprep.subr.bf16.mxu0 %v3092_v14  ;;  %v463_v14 = vlaneseq }
  0x7e   : > { %v464_v15 = vshrl.u32 %v463_v14, 7 }
  0x7f   : > { %1054 = vmatpush1.bf16.msra.mxu0 %v3090_v18  ;;  %2710 = vmatmul.mubr.msk.bf16.vlgmr.msra.gmra.mxu1 %vm963_vm0, %v362_v21 }
  0x80   : > { %1055 = vmatprep.subr.bf16.mxu0 %v3095_v20  ;;  %2863 = vmatpush3.bf16.msra.mxu1 %v3136_v50  ;;  %v465_v16 = vsub.s32 0, %v464_v15  ;;  %v469_v18 = vsub.s32 1, %v464_v15  ;;  %v2728_v50 = vld [vmem:[%s3763_s6 + $0x3] ss:$0 sm:$0xff] }
  0x81   : > { %2864 = vmatprep.subr.bf16.mxu1 %v3137_v51 }
  0x82   : > { %v466_v19 = vrot.slane %v461_v17, %v465_v16  ;;  %v470_v20 = vrot.slane %v461_v17, %v469_v18 }
  0x83   : > { %1056 = vmatpush1.bf16.msra.mxu0 %v3093_v22 }
  0x84   : > { %1057 = vmatprep.subr.bf16.mxu0 %v3098_v23  ;;  %2865 = vmatpush3.bf16.msra.mxu1 %v3138_v52 }
  0x85   : > { %2866 = vmatprep.subr.bf16.mxu1 %v3139_v53 }
  0x87   : > { %1058 = vmatpush1.bf16.msra.mxu0 %v3096_v24 }
  0x88   : > { %1059 = vmatprep.subr.bf16.mxu0 %v3101_v25  ;;  %2867 = vmatpush3.bf16.msra.mxu1 %v3140_v54 }
  0x89   : > { %2868 = vmatprep.subr.bf16.mxu1 %v3141_v55 }
  0x8b   : > { %1060 = vmatpush1.bf16.msra.mxu0 %v3099_v26 }
  0x8c   : > { %1061 = vmatprep.subr.bf16.mxu0 %v3104_v27  ;;  %2869 = vmatpush3.bf16.msra.mxu1 %v3142_v56 }
  0x8d   : > { %2870 = vmatprep.subr.bf16.mxu1 %v3143_v57 }
  0x8f   : > { %1062 = vmatpush1.bf16.msra.mxu0 %v3102_v28 }
  0x90   : > { %1063 = vmatprep.subr.bf16.mxu0 %v3107_v29  ;;  %2871 = vmatpush3.bf16.msra.mxu1 %v3144_v58 }
  0x91   : > { %2872 = vmatprep.subr.bf16.mxu1 %v3145_v59 }
  0x93   : > { %1064 = vmatpush1.bf16.msra.mxu0 %v3105_v30 }
  0x94   : > { %1065 = vmatprep.subr.bf16.mxu0 %v3110_v31  ;;  %2873 = vmatpush3.bf16.msra.mxu1 %v3146_v60 }
  0x95   : > { %2874 = vmatprep.subr.bf16.mxu1 %v3147_v61 }
  0x97   : > { %1066 = vmatpush2.bf16.msra.mxu0 %v3108_v32 }
  0x98   : > { %1067 = vmatprep.subr.bf16.mxu0 %v3113_v33  ;;  %2875 = vmatpush3.bf16.msra.mxu1 %v3148_v62 }
  0x99   : > { %2876 = vmatprep.subr.bf16.mxu1 %v3149_v63 }
  0x9b   : > { %1068 = vmatpush2.bf16.msra.mxu0 %v3111_v34 }
  0x9c   : > { %1069 = vmatprep.subr.bf16.mxu0 %v3116_v35  ;;  %2877 = vmatpush3.bf16.msra.mxu1 %v3150_v0 }
  0x9d   : > { %2911 = vmatprep.subr.bf16.mxu1 %v3462_v1 }
  0x9f   : > { %1070 = vmatpush2.bf16.msra.mxu0 %v3114_v36  ;;  %v3151_v36 = vld [vmem:[%s3760_s3 + $0x18] sm:$0xff]  }
  0xa0   : > { %1071 = vmatprep.subr.bf16.mxu0 %v3119_v37 }
  0xa3   : > { %1072 = vmatpush2.bf16.msra.mxu0 %v3117_v38  ;;  %v3152_v38 = vld [vmem:[%s3760_s3 + $0x10] sm:$0xff]  }
  0xa4   : > { %1073 = vmatprep.subr.bf16.mxu0 %v3122_v39  ;;  %v3153_v39 = vld [vmem:[%s3760_s3 + $0x8] sm:$0xff]  }
  0xa7   : > { %1074 = vmatpush2.bf16.msra.mxu0 %v3120_v40  ;;  %v3154_v40 = vld [vmem:[%s3760_s3] sm:$0xff]  }
  0xa8   : > { %1075 = vmatprep.subr.bf16.mxu0 %v3125_v41 }
  0xab   : > { %1076 = vmatpush2.bf16.msra.mxu0 %v3123_v42  ;;  %v2711_v42 = vld [vmem:[%s3763_s6 + $0x2] ss:$0 sm:$0xff] }
  0xac   : > { %1077 = vmatprep.subr.bf16.mxu0 %v3128_v43 }
  0xaf   : > { %1078 = vmatpush2.bf16.msra.mxu0 %v3126_v44 }
  0xb0   : > { %1079 = vmatprep.subr.bf16.mxu0 %v3134_v45 }
  0xb3   : > { %1080 = vmatpush2.bf16.msra.mxu0 %v3132_v46 }
  0xb6   : > { %1082 = vmatmul.mubr.bf16.vlgmr.msra.gmra.mxu0 %v360_v48 }
 0x136   : > { %v1001_v2 = vpop.f32.mrf.mxu0 }
 0x137   : > { %v1042_v4 = vpop.f32.mrf.mxu1  ;;  %v1002_v21 = vadd.f32 %v1001_v2, %v466_v19 }
 0x138   : > { %v1003_v3 = vpop.f32.mrf.mxu0 }
 0x139   : > { %v1044_v6 = vpop.f32.mrf.mxu1  ;;  %v1004_v22 = vadd.f32 %v1003_v3, %v470_v20  ;;  %v1043_v23 = vadd.f32 %v1042_v4, %v1002_v21  ;;  %v1395_v4 = vld [vmem:[#allocation3] sm:$0x1] }
 0x13a   : > { %v1005_v5 = vpop.f32.mrf.mxu0 }
 0x13b   : > { %v1046_v8 = vpop.f32.mrf.mxu1  ;;  %v1045_v25 = vadd.f32 %v1044_v6, %v1004_v22 }
 0x13c   : > { %v1006_v7 = vpop.f32.mrf.mxu0 }
 0x13d   : > { %v1047_v9 = vpop.f32.mrf.mxu1  ;;  %v1406_v7 = vld [vmem:[#allocation4] sm:$0x1] }
 0x13f   : > { %v1124_v10 = vpop.f32.mrf.mxu1 }
 0x141   : > { %v1126_v11 = vpop.f32.mrf.mxu1 }
 0x143   : > { %v1128_v12 = vpop.f32.mrf.mxu1 }
 0x145   : > { %v1129_v13 = vpop.f32.mrf.mxu1 }
 0x176   : > { %v1083_v24 = vpop.f32.mrf.mxu0 }
 0x177   : > { %v1084_v26 = vadd.f32 %v1083_v24, %v1043_v23 }
 0x178   : > { %v1085_v27 = vpop.f32.mrf.mxu0 }
 0x179   : > { %v1125_v28 = vadd.f32 %v1124_v10, %v1084_v26  ;;  %v1086_v29 = vadd.f32 %v1085_v27, %v1045_v25 }
 0x17a   : > { %v1087_v30 = vpop.f32.mrf.mxu0 }
 0x17b   : > { %v1127_v31 = vadd.f32 %v1126_v11, %v1086_v29  ;;  %v1131_v32 = vmax.f32 %v1125_v28, 0.0 }
 0x17c   : > { %v1088_v33 = vpop.f32.mrf.mxu0 }
 0x17d   : > { %v1132_v34 = vmax.f32 %v1127_v31, 0.0  ;;  %v1133_v37 = vpack.c.bf16 %v1131_v32, %v1131_v32 }
 0x17f   : > { %v1134_v35 = vpack.c.bf16 %v1132_v34, %v1132_v34 }
 0x181   : > { %1302 = vmatprep.mubr.bf16.mxu1 %v1134_v35 }
 0x182   : > { %1303 = vmatmul.mubr.bf16.vlgmr.msra.gmra.mxu1 %v1133_v37 }
 0x183   : > { %2912 = vmatpush3.bf16.msra.mxu1 %v3151_v36  ;;  %2919 = vmatprep.mubr.msk.bf16.mxu1 %vm3463_vm1, %v3462_v1 }
 0x184   : > { %2913 = vmatprep.subr.bf16.mxu1 %v3462_v1 }
 0x187   : > { %2914 = vmatpush3.bf16.msra.mxu1 %v3152_v38 }
 0x188   : > { %2915 = vmatprep.subr.bf16.mxu1 %v3462_v1 }
 0x18b   : > { %2916 = vmatpush3.bf16.msra.mxu1 %v3153_v39 }
 0x18c   : > { %2917 = vmatprep.subr.bf16.mxu1 %v3462_v1 }
 0x18f   : > { %2918 = vmatpush3.bf16.msra.mxu1 %v3154_v40 }
 0x242   : > { %v2878_v41 = vpop.f32.mrf.mxu1 }
 0x244   : > { %v2879_v43 = vpop.f32.mrf.mxu1 }
 0x245   : > { %v2880_v44 = vadd.f32 %v2879_v43, %v2878_v41 }
 0x246   : > { %v2881_v45 = vpop.f32.mrf.mxu1 }
 0x247   : > { %v1305_v46 = vadd.f32 %v2880_v44, %v2711_v42 }
 0x248   : > { %v2882_v47 = vpop.f32.mrf.mxu1 }
 0x249   : > { %v1310_v48 = vmax.f32 %v1305_v46, 0.0 }
 0x24b   : > { %v1311_v49 = vpack.c.bf16 %v1310_v48, %v1310_v48 }
 0x24d   : > { %2920 = vmatmul.mubr.msk.bf16.vlgmr.msra.gmra.mxu1 %vm1351_vm3, %v1311_v49 }
 0x30d   : > { %v1389_v51 = vpop.f32.mrf.mxu1 }
 0x30e   : > { %v1390_v52 = vadd.f32 %v2728_v50, %v1389_v51 }
 0x30f   : > { %v2921_v53 = vpop.f32.mrf.mxu1 }
 0x310   : > { %v1396_v54 = vsel %vm1351_vm3, %v1390_v52, 0.0  ;;  %v1407_v55 = vmul.f32 %v1390_v52, %v1390_v52  ;;  %1418 = vst.msk [vmem:[#allocation2] sm:$0xff] %vm1351_vm3, %v1390_v52 }
 0x311   : > { %v1397_v56 = vrot.slane %v1396_v54, 4  ;;  %v1392_v57 = vpop.f32.mrf.mxu1 }
 0x312   : > { %v1408_v58 = vsel %vm1351_vm3, %v1407_v55, 0.0 }
 0x313   : > { %v1398_v59 = vadd.f32 %v1397_v56, %v1396_v54  ;;  %v1409_v60 = vrot.slane %v1408_v58, 4  ;;  %v2922_v61 = vpop.f32.mrf.mxu1 }
 0x315   : > { %v1399_v62 = vrot.slane %v1398_v59, 2  ;;  %v1410_v63 = vadd.f32 %v1409_v60, %v1408_v58 }
 0x317   : > { %v1400_v0 = vadd.f32 %v1399_v62, %v1398_v59  ;;  %v1411_v1 = vrot.slane %v1410_v63, 2 }
 0x319   : > { %v1401_v2 = vrot.slane %v1400_v0, 1  ;;  %v1412_v3 = vadd.f32 %v1411_v1, %v1410_v63 }
 0x31b   : > { %v1402_v5 = vadd.f32 %v1401_v2, %v1400_v0  ;;  %v1413_v6 = vrot.slane %v1412_v3, 1 }
 0x31d   : > { %v1403_v8 = vadd.f32 %v1402_v5, %v1395_v4  ;;  %v1414_v9 = vadd.f32 %v1413_v6, %v1412_v3 }
 0x31f   : > { %1405 = vst.msk [vmem:[#allocation3] sm:$0x1] %vm346_vm2, %v1403_v8  ;;  %v1415_v10 = vadd.f32 %v1414_v9, %v1406_v7 }
 0x321   : > { %1416 = vst.msk [vmem:[#allocation4] sm:$0x1] %vm346_vm2, %v1415_v10 }
 0x322 PF: > { %p2734_p3 = scmp.ne.s32.totalorder %s3445_s24, 1 }
 0x324   : > { %1422 = sbr.rel (%p2734_p3) target bundleno = 1324 (0x52c), region = 68 }
 0x329   : > { %v3155_v11 = vld [vmem:[%s3761_s4 + $0x34] ss:$8 sps:$4 sm:$0xff]   ;;  %v3157_v12 = vld [vmem:[%s3761_s4 + $0x30] ss:$8 sps:$4 sm:$0xff]   ;;  %v3464_v13 = vmov 0   ;;  %v1434_v27 = vlaneseq  ;;  %v1432_v40 = vld [vmem:[#allocation2] sm:$0xff] }
 0x32a   : > { %1561 = vmatprep.mubr.bf16.mxu0 %v3464_v13  ;;  %1537 = vmatprep.subr.bf16.mxu0 %v3155_v11  ;;  %v3158_v14 = vld [vmem:[%s3761_s4 + $0x24] ss:$8 sps:$4 sm:$0xff]   ;;  %v3160_v15 = vld [vmem:[%s3761_s4 + $0x20] ss:$8 sps:$4 sm:$0xff]   ;;  %v3161_v16 = vld [vmem:[%s3761_s4 + $0x14] ss:$8 sps:$4 sm:$0xff]  }
 0x32b   : > { %1538 = vmatpush1.bf16.msra.mxu0 %v3157_v12  ;;  %v1423_v17 = vld [vmem:[#allocation3] sm:$0x1]  ;;  %v1425_v18 = vld [vmem:[#allocation4] sm:$0x1]  ;;  %v3163_v21 = vld [vmem:[%s3761_s4 + $0x10] ss:$8 sps:$4 sm:$0xff]  }
 0x32c   : > { %1539 = vmatprep.subr.bf16.mxu0 %v3158_v14  ;;  %v1424_v19 = vmul.f32 0.125, %v1423_v17  ;;  %v1426_v20 = vmul.f32 0.125, %v1425_v18  ;;  %v3167_v22 = vld [vmem:[#allocation8 + $0x18c] ss:$28 sps:$4 sm:$0xff]   ;;  %v3173_v28 = vld [vmem:[#allocation8 + $0x154] ss:$28 sps:$4 sm:$0xff]  }
 0x32d   : > { %v3164_v23 = vld [vmem:[%s3761_s4 + $0x4] ss:$8 sps:$4 sm:$0xff]   ;;  %2315 = vmatprep.subr.bf16.mxu1 %v3167_v22  ;;  %v3166_v29 = vld [vmem:[%s3761_s4] ss:$8 sps:$4 sm:$0xff]   ;;  %v3179_v33 = vld [vmem:[#allocation8 + $0x11c] ss:$28 sps:$4 sm:$0xff]  }
 0x32e   : > { %v1427_v24 = vmul.f32 %v1424_v19, %v1424_v19  ;;  %v3172_v25 = vld [vmem:[#allocation8 + $0x188] ss:$28 sps:$4 sm:$0xff]   ;;  %v3171_v30 = vld [vmem:[#allocation8 + $0x194] ss:$28 sps:$4 sm:$0xff]   ;;  %v3695_v34 = vshrl.u32 %v1434_v27, 7  ;;  %vm1525_vm4 = vcmask 523264  }
 0x32f   : > { %1540 = vmatpush1.bf16.msra.mxu0 %v3160_v15  ;;  %2316 = vmatpush1.bf16.msra.mxu1 %v3172_v25  ;;  %v3178_v32 = vld [vmem:[#allocation8 + $0x150] ss:$28 sps:$4 sm:$0xff]   ;;  %v3184_v35 = vld [vmem:[#allocation8 + $0x118] ss:$28 sps:$4 sm:$0xff]   ;;  %v3185_v36 = vld [vmem:[#allocation8 + $0xe4] ss:$28 sps:$4 sm:$0xff]  }
 0x330   : > { %1541 = vmatprep.subr.bf16.mxu0 %v3161_v16  ;;  %v1428_v26 = vsub.f32 %v1426_v20, %v1427_v24  ;;  %2317 = vmatprep.subr.bf16.mxu1 %v3173_v28  ;;  %v3698_v37 = vsub.s32 0, %v3695_v34  ;;  %v3190_v38 = vld [vmem:[#allocation8 + $0xe0] ss:$28 sps:$4 sm:$0xff]   ;;  %v3191_v39 = vld [vmem:[#allocation8 + $0xac] ss:$28 sps:$4 sm:$0xff]  }
 0x331   : > { %v3196_v42 = vld [vmem:[#allocation8 + $0xa8] ss:$28 sps:$4 sm:$0xff]   ;;  %v3197_v43 = vld [vmem:[#allocation8 + $0x74] ss:$28 sps:$4 sm:$0xff]   ;;  %v3203_v48 = vld [vmem:[#allocation8 + $0x3c] ss:$28 sps:$4 sm:$0xff]  }
 0x332   : > { %v1429_v31 = vadd.f32 1e-05, %v1428_v26  ;;  %v1437_v41 = vrot.slane %v1424_v19, %v3698_v37  ;;  %v3202_v46 = vld [vmem:[#allocation8 + $0x70] ss:$28 sps:$4 sm:$0xff]   ;;  %v2735_v49 = vld [vmem:[%s3763_s6 + $0x4] ss:$0 sm:$0xff] }
 0x333   : > { %1542 = vmatpush1.bf16.msra.mxu0 %v3163_v21  ;;  %2318 = vmatpush1.bf16.msra.mxu1 %v3178_v32  ;;  %v2736_v51 = vld [vmem:[%s3763_s6 + $0x5] ss:$0 sm:$0xff]  ;;  %v3208_v52 = vld [vmem:[#allocation8 + $0x38] ss:$28 sps:$4 sm:$0xff]   ;;  %v3209_v54 = vld [vmem:[#allocation8 + $0x4] ss:$28 sps:$4 sm:$0xff]  }
 0x334   : > { %1543 = vmatprep.subr.bf16.mxu0 %v3164_v23  ;;  %3327 = vrsqrt.f32 %v1429_v31  ;;  %2319 = vmatprep.subr.bf16.mxu1 %v3179_v33  ;;  %v1439_v44 = vsub.f32 %v1432_v40, %v1437_v41  ;;  %v3214_v56 = vld [vmem:[#allocation8] ss:$28 sps:$4 sm:$0xff]   ;;  %v3215_v58 = vld [vmem:[#allocation8 + $0x34c] ss:$28 sps:$4 sm:$0xff]   ;;  %v3221_v63 = vld [vmem:[#allocation8 + $0x314] ss:$28 sps:$4 sm:$0xff]  }
 0x335   : > { %v3169_v59 = vld [vmem:[#allocation8 + $0x190] ss:$28 sps:$4 sm:$0xff]   ;;  %v3177_v61 = vld [vmem:[#allocation8 + $0x15c] ss:$28 sps:$4 sm:$0xff]   ;;  %v3220_v62 = vld [vmem:[#allocation8 + $0x348] ss:$28 sps:$4 sm:$0xff]  }
 0x336   : > { %v3175_v0 = vld [vmem:[#allocation8 + $0x158] ss:$28 sps:$4 sm:$0xff]   ;;  %v3183_v1 = vld [vmem:[#allocation8 + $0x124] ss:$28 sps:$4 sm:$0xff]   ;;  %v3226_v3 = vld [vmem:[#allocation8 + $0x310] ss:$28 sps:$4 sm:$0xff]  }
 0x337   : > { %1544 = vmatpush1.bf16.msra.mxu0 %v3166_v29  ;;  %2320 = vmatpush1.bf16.msra.mxu1 %v3184_v35  ;;  %v3181_v2 = vld [vmem:[#allocation8 + $0x120] ss:$28 sps:$4 sm:$0xff]   ;;  %v3189_v4 = vld [vmem:[#allocation8 + $0xec] ss:$28 sps:$4 sm:$0xff]   ;;  %v3232_v6 = vld [vmem:[#allocation8 + $0x2d8] ss:$28 sps:$4 sm:$0xff]  }
 0x338   : > { %2356 = vmatprep.subr.bf16.mxu0 %v3171_v30  ;;  %2321 = vmatprep.subr.bf16.mxu1 %v3185_v36  ;;  %v3227_v5 = vld [vmem:[#allocation8 + $0x2dc] ss:$28 sps:$4 sm:$0xff]   ;;  %v3233_v7 = vld [vmem:[#allocation8 + $0x2a4] ss:$28 sps:$4 sm:$0xff]   ;;  %v3195_v9 = vld [vmem:[#allocation8 + $0xb4] ss:$28 sps:$4 sm:$0xff]  }
 0x339   : > { %v3187_v8 = vld [vmem:[#allocation8 + $0xe8] ss:$28 sps:$4 sm:$0xff]   ;;  %v3238_v10 = vld [vmem:[#allocation8 + $0x2a0] ss:$28 sps:$4 sm:$0xff]   ;;  %v3193_v12 = vld [vmem:[#allocation8 + $0xb0] ss:$28 sps:$4 sm:$0xff]  }
 0x33a   : > { %v3239_v11 = vld [vmem:[#allocation8 + $0x26c] ss:$28 sps:$4 sm:$0xff]   ;;  %v3201_v13 = vld [vmem:[#allocation8 + $0x7c] ss:$28 sps:$4 sm:$0xff]   ;;  %v3245_v15 = vld [vmem:[#allocation8 + $0x234] ss:$28 sps:$4 sm:$0xff]  }
 0x33b   : > { %2322 = vmatpush1.bf16.msra.mxu1 %v3190_v38  ;;  %v3244_v14 = vld [vmem:[#allocation8 + $0x268] ss:$28 sps:$4 sm:$0xff]   ;;  %v3199_v16 = vld [vmem:[#allocation8 + $0x78] ss:$28 sps:$4 sm:$0xff]   ;;  %v3250_v18 = vld [vmem:[#allocation8 + $0x230] ss:$28 sps:$4 sm:$0xff]  }
 0x33c   : > { %2323 = vmatprep.subr.bf16.mxu1 %v3191_v39  ;;  %v3207_v17 = vld [vmem:[#allocation8 + $0x44] ss:$28 sps:$4 sm:$0xff]   ;;  %v3213_v20 = vld [vmem:[#allocation8 + $0xc] ss:$28 sps:$4 sm:$0xff]   ;;  %v3219_v22 = vld [vmem:[#allocation8 + $0x354] ss:$28 sps:$4 sm:$0xff]  }
 0x33d   : > { %v3205_v19 = vld [vmem:[#allocation8 + $0x40] ss:$28 sps:$4 sm:$0xff]   ;;  %v3211_v21 = vld [vmem:[#allocation8 + $0x8] ss:$28 sps:$4 sm:$0xff]   ;;  %v3217_v23 = vld [vmem:[#allocation8 + $0x350] ss:$28 sps:$4 sm:$0xff]  }
 0x33e   : > { %v3225_v24 = vld [vmem:[#allocation8 + $0x31c] ss:$28 sps:$4 sm:$0xff]   ;;  %v3231_v26 = vld [vmem:[#allocation8 + $0x2e4] ss:$28 sps:$4 sm:$0xff]   ;;  %v3237_v28 = vld [vmem:[#allocation8 + $0x2ac] ss:$28 sps:$4 sm:$0xff]  }
 0x33f   : > { %2324 = vmatpush1.bf16.msra.mxu1 %v3196_v42  ;;  %v3223_v25 = vld [vmem:[#allocation8 + $0x318] ss:$28 sps:$4 sm:$0xff]   ;;  %v3229_v27 = vld [vmem:[#allocation8 + $0x2e0] ss:$28 sps:$4 sm:$0xff]   ;;  %v3235_v29 = vld [vmem:[#allocation8 + $0x2a8] ss:$28 sps:$4 sm:$0xff]  }
 0x340   : > { %2325 = vmatprep.subr.bf16.mxu1 %v3197_v43  ;;  %v3243_v30 = vld [vmem:[#allocation8 + $0x274] ss:$28 sps:$4 sm:$0xff]   ;;  %v3249_v32 = vld [vmem:[#allocation8 + $0x23c] ss:$28 sps:$4 sm:$0xff]   ;;  %v3255_v36 = vld [vmem:[#allocation8 + $0x204] ss:$28 sps:$4 sm:$0xff]  }
 0x341   : > { %v3328_v45 = vpop.eup %3327  ;;  %v3241_v31 = vld [vmem:[#allocation8 + $0x270] ss:$28 sps:$4 sm:$0xff]   ;;  %v3247_v33 = vld [vmem:[#allocation8 + $0x238] ss:$28 sps:$4 sm:$0xff]   ;;  %v3253_v38 = vld [vmem:[#allocation8 + $0x200] ss:$28 sps:$4 sm:$0xff]  }
 0x342   : > { %v1444_v47 = vrot.slane %v3328_v45, %v3698_v37  ;;  %v3251_v35 = vld [vmem:[#allocation8 + $0x1fc] ss:$28 sps:$4 sm:$0xff]   ;;  %v3257_v40 = vld [vmem:[#allocation8 + $0x1c4] ss:$28 sps:$4 sm:$0xff]   ;;  %v3261_v41 = vld [vmem:[#allocation8 + $0x1cc] ss:$28 sps:$4 sm:$0xff]  }
 0x343   : > { %2326 = vmatpush1.bf16.msra.mxu1 %v3202_v46  ;;  %v3256_v39 = vld [vmem:[#allocation8 + $0x1f8] ss:$28 sps:$4 sm:$0xff]   ;;  %v3259_v42 = vld [vmem:[#allocation8 + $0x1c8] ss:$28 sps:$4 sm:$0xff]   ;;  %v3262_v43 = vld [vmem:[#allocation8 + $0x1c0] ss:$28 sps:$4 sm:$0xff]  }
 0x344   : > { %v1446_v50 = vmul.f32 %v1444_v47, %v1439_v44  ;;  %2327 = vmatprep.subr.bf16.mxu1 %v3203_v48  ;;  %v3265_v44 = vld [vmem:[#allocation8 + $0x19c] ss:$28 sps:$4 sm:$0xff]   ;;  %v1473_v46 = vld [vmem:[%s3763_s6 + $0x6] sm:$0x3]  ;;  %v1481_v47 = vsub.s32 1, %v3695_v34 }
 0x345   : > { %v3266_v45 = vld [vmem:[#allocation8 + $0x360] ss:$28 sps:$4 sm:$0xff]   ;;  %v1478_v48 = vrot.slane %v1473_v46, %v3698_v37 }
 0x346   : > { %v1454_v53 = vmul.f32 %v2735_v49, %v1446_v50  ;;  %v1482_v49 = vrot.slane %v1473_v46, %v1481_v47  ;;  %v1718_v46 = vsub.s32 3, %v3695_v34 }
 0x347   : > { %2328 = vmatpush1.bf16.msra.mxu1 %v3208_v52 }
 0x348   : > { %v1462_v55 = vadd.f32 %v2736_v51, %v1454_v53  ;;  %2329 = vmatprep.subr.bf16.mxu1 %v3209_v54 }
 0x34a   : > { %v1463_v57 = vmax.f32 %v1462_v55, 0.0 }
 0x34b   : > { %2330 = vmatpush1.bf16.msra.mxu1 %v3214_v56 }
 0x34c   : > { %v1464_v60 = vpack.c.bf16 %v1463_v57, %v1463_v57  ;;  %2331 = vmatprep.subr.bf16.mxu1 %v3215_v58 }
 0x34e   : > { %2745 = vmatmul.mubr.msk.bf16.vlgmr.msra.gmra.mxu0 %vm1525_vm4, %v1464_v60  ;;  %v3267_v60 = vld [vmem:[#allocation8 + $0x1a0] ss:$28 sps:$4 sm:$0xff]  }
 0x34f   : > { %2357 = vmatpush1.bf16.msra.mxu0 %v3169_v59  ;;  %2332 = vmatpush2.bf16.msra.mxu1 %v3220_v62  ;;  %v3263_v59 = vld [vmem:[#allocation8 + $0x198] ss:$28 sps:$4 sm:$0xff]   ;;  %v3270_v62 = vld [vmem:[#allocation8 + $0x164] ss:$28 sps:$4 sm:$0xff]  }
 0x350   : > { %2358 = vmatprep.subr.bf16.mxu0 %v3177_v61  ;;  %2333 = vmatprep.subr.bf16.mxu1 %v3221_v63  ;;  %v3271_v63 = vld [vmem:[#allocation8 + $0x328] ss:$28 sps:$4 sm:$0xff]  }
 0x353   : > { %2359 = vmatpush1.bf16.msra.mxu0 %v3175_v0  ;;  %2334 = vmatpush2.bf16.msra.mxu1 %v3226_v3  ;;  %v3268_v0 = vld [vmem:[#allocation8 + $0x160] ss:$28 sps:$4 sm:$0xff]   ;;  %v3276_v3 = vld [vmem:[#allocation8 + $0x2f0] ss:$28 sps:$4 sm:$0xff]  }
 0x354   : > { %2360 = vmatprep.subr.bf16.mxu0 %v3183_v1  ;;  %2335 = vmatprep.subr.bf16.mxu1 %v3227_v5  ;;  %v3272_v1 = vld [vmem:[#allocation8 + $0x168] ss:$28 sps:$4 sm:$0xff]   ;;  %v3277_v5 = vld [vmem:[#allocation8 + $0x130] ss:$28 sps:$4 sm:$0xff]  }
 0x357   : > { %2361 = vmatpush1.bf16.msra.mxu0 %v3181_v2  ;;  %2336 = vmatpush2.bf16.msra.mxu1 %v3232_v6  ;;  %v3275_v2 = vld [vmem:[#allocation8 + $0x12c] ss:$28 sps:$4 sm:$0xff]   ;;  %v3280_v6 = vld [vmem:[#allocation8 + $0xf4] ss:$28 sps:$4 sm:$0xff]  }
 0x358   : > { %2362 = vmatprep.subr.bf16.mxu0 %v3189_v4  ;;  %2337 = vmatprep.subr.bf16.mxu1 %v3233_v7  ;;  %v3273_v4 = vld [vmem:[#allocation8 + $0x128] ss:$28 sps:$4 sm:$0xff]   ;;  %v3281_v7 = vld [vmem:[#allocation8 + $0x2b8] ss:$28 sps:$4 sm:$0xff]  }
 0x35b   : > { %2363 = vmatpush1.bf16.msra.mxu0 %v3187_v8  ;;  %2338 = vmatpush2.bf16.msra.mxu1 %v3238_v10  ;;  %v3278_v8 = vld [vmem:[#allocation8 + $0xf0] ss:$28 sps:$4 sm:$0xff]   ;;  %v3285_v10 = vld [vmem:[#allocation8 + $0xbc] ss:$28 sps:$4 sm:$0xff]  }
 0x35c   : > { %2364 = vmatprep.subr.bf16.mxu0 %v3195_v9  ;;  %2339 = vmatprep.subr.bf16.mxu1 %v3239_v11  ;;  %v3282_v9 = vld [vmem:[#allocation8 + $0xf8] ss:$28 sps:$4 sm:$0xff]   ;;  %v3286_v11 = vld [vmem:[#allocation8 + $0x280] ss:$28 sps:$4 sm:$0xff]  }
 0x35f   : > { %2365 = vmatpush1.bf16.msra.mxu0 %v3193_v12  ;;  %2340 = vmatpush2.bf16.msra.mxu1 %v3244_v14  ;;  %v3283_v12 = vld [vmem:[#allocation8 + $0xb8] ss:$28 sps:$4 sm:$0xff]   ;;  %v3290_v14 = vld [vmem:[#allocation8 + $0x84] ss:$28 sps:$4 sm:$0xff]  }
 0x360   : > { %2366 = vmatprep.subr.bf16.mxu0 %v3201_v13  ;;  %2341 = vmatprep.subr.bf16.mxu1 %v3245_v15  ;;  %v3287_v13 = vld [vmem:[#allocation8 + $0xc0] ss:$28 sps:$4 sm:$0xff]   ;;  %v3291_v15 = vld [vmem:[#allocation8 + $0x248] ss:$28 sps:$4 sm:$0xff]  }
 0x363   : > { %2367 = vmatpush1.bf16.msra.mxu0 %v3199_v16  ;;  %2342 = vmatpush2.bf16.msra.mxu1 %v3250_v18  ;;  %v3288_v16 = vld [vmem:[#allocation8 + $0x80] ss:$28 sps:$4 sm:$0xff]   ;;  %v3295_v18 = vld [vmem:[#allocation8 + $0x4c] ss:$28 sps:$4 sm:$0xff]  }
 0x364   : > { %2368 = vmatprep.subr.bf16.mxu0 %v3207_v17  ;;  %2343 = vmatprep.subr.bf16.mxu1 %v3251_v35  ;;  %v3292_v17 = vld [vmem:[#allocation8 + $0x88] ss:$28 sps:$4 sm:$0xff]   ;;  %v3317_v35 = vld [vmem:[#allocation8 + $0x27c] ss:$28 sps:$4 sm:$0xff]  }
 0x367   : > { %2369 = vmatpush1.bf16.msra.mxu0 %v3205_v19  ;;  %2344 = vmatpush2.bf16.msra.mxu1 %v3256_v39  ;;  %v3296_v19 = vld [vmem:[#allocation8 + $0x210] ss:$28 sps:$4 sm:$0xff]   ;;  %v3318_v39 = vld [vmem:[#allocation8 + $0x240] ss:$28 sps:$4 sm:$0xff]  }
 0x368   : > { %2370 = vmatprep.subr.bf16.mxu0 %v3213_v20  ;;  %2345 = vmatprep.subr.bf16.mxu1 %v3257_v40  ;;  %v3293_v20 = vld [vmem:[#allocation8 + $0x48] ss:$28 sps:$4 sm:$0xff]  }
 0x369   : > { %v3323_v40 = vld [vmem:[#allocation8 + $0x20c] ss:$28 sps:$4 sm:$0xff]  }
 0x36b   : > { %2371 = vmatpush1.bf16.msra.mxu0 %v3211_v21  ;;  %2346 = vmatpush2.bf16.msra.mxu1 %v3262_v43  ;;  %v3297_v21 = vld [vmem:[#allocation8 + $0x50] ss:$28 sps:$4 sm:$0xff]  }
 0x36c   : > { %2372 = vmatprep.subr.bf16.mxu0 %v3219_v22  ;;  %2397 = vmatprep.subr.bf16.mxu1 %v3265_v44  ;;  %v3300_v22 = vld [vmem:[#allocation8 + $0x14] ss:$28 sps:$4 sm:$0xff]   ;;  %v1714_v44 = vsub.s32 2, %v3695_v34 }
 0x36d   : > { %v3324_v43 = vld [vmem:[#allocation8 + $0x1d0] ss:$28 sps:$4 sm:$0xff]  }
 0x36f   : > { %2373 = vmatpush2.bf16.msra.mxu0 %v3217_v23  ;;  %v3301_v23 = vld [vmem:[#allocation8 + $0x1d8] ss:$28 sps:$4 sm:$0xff]  }
 0x370   : > { %2374 = vmatprep.subr.bf16.mxu0 %v3225_v24  ;;  %v3298_v24 = vld [vmem:[#allocation8 + $0x10] ss:$28 sps:$4 sm:$0xff]  }
 0x373   : > { %2375 = vmatpush2.bf16.msra.mxu0 %v3223_v25  ;;  %v3302_v25 = vld [vmem:[#allocation8 + $0x18] ss:$28 sps:$4 sm:$0xff]  }
 0x374   : > { %2376 = vmatprep.subr.bf16.mxu0 %v3231_v26  ;;  %v3305_v26 = vld [vmem:[#allocation8 + $0x35c] ss:$28 sps:$4 sm:$0xff]  }
 0x377   : > { %2377 = vmatpush2.bf16.msra.mxu0 %v3229_v27  ;;  %v3303_v27 = vld [vmem:[#allocation8 + $0x358] ss:$28 sps:$4 sm:$0xff]  }
 0x378   : > { %2378 = vmatprep.subr.bf16.mxu0 %v3237_v28  ;;  %v3308_v28 = vld [vmem:[#allocation8 + $0x324] ss:$28 sps:$4 sm:$0xff]  }
 0x37b   : > { %2379 = vmatpush2.bf16.msra.mxu0 %v3235_v29  ;;  %v3306_v29 = vld [vmem:[#allocation8 + $0x320] ss:$28 sps:$4 sm:$0xff]  }
 0x37c   : > { %2380 = vmatprep.subr.bf16.mxu0 %v3243_v30  ;;  %v3311_v30 = vld [vmem:[#allocation8 + $0x2ec] ss:$28 sps:$4 sm:$0xff]  }
 0x37f   : > { %2381 = vmatpush2.bf16.msra.mxu0 %v3241_v31  ;;  %v3309_v31 = vld [vmem:[#allocation8 + $0x2e8] ss:$28 sps:$4 sm:$0xff]  }
 0x380   : > { %2382 = vmatprep.subr.bf16.mxu0 %v3249_v32  ;;  %v3314_v32 = vld [vmem:[#allocation8 + $0x2b4] ss:$28 sps:$4 sm:$0xff]  }
 0x383   : > { %2383 = vmatpush2.bf16.msra.mxu0 %v3247_v33  ;;  %v3312_v33 = vld [vmem:[#allocation8 + $0x2b0] ss:$28 sps:$4 sm:$0xff]  }
 0x384   : > { %2384 = vmatprep.subr.bf16.mxu0 %v3255_v36  ;;  %v3315_v36 = vld [vmem:[#allocation8 + $0x278] ss:$28 sps:$4 sm:$0xff]  }
 0x387   : > { %2385 = vmatpush2.bf16.msra.mxu0 %v3253_v38  ;;  %v3320_v38 = vld [vmem:[#allocation8 + $0x244] ss:$28 sps:$4 sm:$0xff]  }
 0x388   : > { %2386 = vmatprep.subr.bf16.mxu0 %v3261_v41  ;;  %v3321_v41 = vld [vmem:[#allocation8 + $0x208] ss:$28 sps:$4 sm:$0xff]  }
 0x38b   : > { %2387 = vmatpush2.bf16.msra.mxu0 %v3259_v42  ;;  %v3326_v42 = vld [vmem:[#allocation8 + $0x1d4] ss:$28 sps:$4 sm:$0xff]  }
 0x38c   : > { %2889 = vmatprep.subr.bf16.mxu0 %v3266_v45  ;;  %v1702_v45 = vld [vmem:[%s3763_s6 + $0x8] sm:$0xff] }
 0x40e   : > { %v1563_v50 = vpop.f32.mrf.mxu0 }
 0x40f   : > { %v1564_v51 = vadd.f32 %v1563_v50, %v1478_v48  ;;  %v1707_v48 = vrot.slane %v1702_v45, %v3698_v37  ;;  %v1711_v50 = vrot.slane %v1702_v45, %v1481_v47 }
 0x410   : > { %v1565_v52 = vpop.f32.mrf.mxu0 }
 0x411   : > { %v1566_v53 = vadd.f32 %v1565_v52, %v1482_v49  ;;  %v1570_v54 = vmax.f32 %v1564_v51, 0.0  ;;  %v1715_v49 = vrot.slane %v1702_v45, %v1714_v44  ;;  %v1719_v51 = vrot.slane %v1702_v45, %v1718_v46 }
 0x412   : > { %v1567_v55 = vpop.f32.mrf.mxu0 }
 0x413   : > { %v1571_v56 = vmax.f32 %v1566_v53, 0.0  ;;  %v3715_v61 = vpack.c.bf16 %v1570_v54, %v1570_v54 }
 0x414   : > { %v1568_v57 = vpop.f32.mrf.mxu0 }
 0x415   : > { %v1573_v58 = vpack.c.bf16 %v1571_v56, %v1571_v56 }
 0x417   : > { %2347 = vmatprep.mubr.bf16.mxu1 %v1573_v58  ;;  %2388 = vmatprep.mubr.bf16.mxu0 %v1573_v58 }
 0x418   : > { %2348 = vmatmul.mubr.bf16.vlgmr.msra.gmra.mxu1 %v3715_v61  ;;  %2389 = vmatmul.mubr.bf16.vlgmr.msra.gmra.mxu0 %v3715_v61 }
 0x419   : > { %2398 = vmatpush1.bf16.msra.mxu1 %v3263_v59  ;;  %2890 = vmatpush3.bf16.msra.mxu0 %v3267_v60 }
 0x41a   : > { %2429 = vmatprep.mubr.bf16.mxu1 %v1573_v58  ;;  %2470 = vmatprep.mubr.bf16.mxu0 %v1573_v58 }
 0x41b   : > { %2399 = vmatprep.subr.bf16.mxu1 %v3270_v62  ;;  %2891 = vmatprep.subr.bf16.mxu0 %v3271_v63 }
 0x41d   : > { %2400 = vmatpush1.bf16.msra.mxu1 %v3268_v0  ;;  %2892 = vmatpush3.bf16.msra.mxu0 %v3272_v1 }
 0x41e   : > { %2401 = vmatprep.subr.bf16.mxu1 %v3275_v2  ;;  %2893 = vmatprep.subr.bf16.mxu0 %v3276_v3  ;;  %v1730_v2 = vsub.s32 6, %v3695_v34 }
 0x421   : > { %2402 = vmatpush1.bf16.msra.mxu1 %v3273_v4  ;;  %2894 = vmatpush3.bf16.msra.mxu0 %v3277_v5  ;;  %v1731_v4 = vrot.slane %v1702_v45, %v1730_v2 }
 0x422   : > { %2403 = vmatprep.subr.bf16.mxu1 %v3280_v6  ;;  %2895 = vmatprep.subr.bf16.mxu0 %v3281_v7 }
 0x425   : > { %2404 = vmatpush1.bf16.msra.mxu1 %v3278_v8  ;;  %2896 = vmatpush3.bf16.msra.mxu0 %v3282_v9 }
 0x426   : > { %2405 = vmatprep.subr.bf16.mxu1 %v3285_v10  ;;  %2897 = vmatprep.subr.bf16.mxu0 %v3286_v11  ;;  %v1722_v11 = vsub.s32 4, %v3695_v34 }
 0x429   : > { %2406 = vmatpush1.bf16.msra.mxu1 %v3283_v12  ;;  %2898 = vmatpush3.bf16.msra.mxu0 %v3287_v13  ;;  %v1726_v12 = vsub.s32 5, %v3695_v34  ;;  %v1723_v13 = vrot.slane %v1702_v45, %v1722_v11 }
 0x42a   : > { %2407 = vmatprep.subr.bf16.mxu1 %v3290_v14  ;;  %2899 = vmatprep.subr.bf16.mxu0 %v3291_v15 }
 0x42b   : > { %v1727_v14 = vrot.slane %v1702_v45, %v1726_v12 }
 0x42d   : > { %2408 = vmatpush1.bf16.msra.mxu1 %v3288_v16  ;;  %2900 = vmatpush3.bf16.msra.mxu0 %v3292_v17 }
 0x42e   : > { %2409 = vmatprep.subr.bf16.mxu1 %v3295_v18  ;;  %2901 = vmatprep.subr.bf16.mxu0 %v3296_v19 }
 0x431   : > { %2410 = vmatpush1.bf16.msra.mxu1 %v3293_v20  ;;  %2902 = vmatpush3.bf16.msra.mxu0 %v3297_v21 }
 0x432   : > { %2411 = vmatprep.subr.bf16.mxu1 %v3300_v22  ;;  %2903 = vmatprep.subr.bf16.mxu0 %v3301_v23 }
 0x435   : > { %2412 = vmatpush1.bf16.msra.mxu1 %v3298_v24  ;;  %2904 = vmatpush3.bf16.msra.mxu0 %v3302_v25 }
 0x436   : > { %2413 = vmatprep.subr.bf16.mxu1 %v3305_v26 }
 0x438   : > { %2471 = vmatmul.mubr.bf16.vlgmr.msra.gmra.mxu0 %v3715_v61 }
 0x439   : > { %2414 = vmatpush2.bf16.msra.mxu1 %v3303_v27 }
 0x43a   : > { %2415 = vmatprep.subr.bf16.mxu1 %v3308_v28 }
 0x43d   : > { %2416 = vmatpush2.bf16.msra.mxu1 %v3306_v29 }
 0x43e   : > { %2417 = vmatprep.subr.bf16.mxu1 %v3311_v30 }
 0x441   : > { %2418 = vmatpush2.bf16.msra.mxu1 %v3309_v31 }
 0x442   : > { %2419 = vmatprep.subr.bf16.mxu1 %v3314_v32 }
 0x445   : > { %2420 = vmatpush2.bf16.msra.mxu1 %v3312_v33 }
 0x446   : > { %2421 = vmatprep.subr.bf16.mxu1 %v3317_v35 }
 0x449   : > { %2422 = vmatpush2.bf16.msra.mxu1 %v3315_v36 }
 0x44a   : > { %2423 = vmatprep.subr.bf16.mxu1 %v3320_v38 }
 0x44d   : > { %2424 = vmatpush2.bf16.msra.mxu1 %v3318_v39 }
 0x44e   : > { %2425 = vmatprep.subr.bf16.mxu1 %v3323_v40 }
 0x451   : > { %2426 = vmatpush2.bf16.msra.mxu1 %v3321_v41 }
 0x452   : > { %2427 = vmatprep.subr.bf16.mxu1 %v3326_v42 }
 0x455   : > { %2428 = vmatpush2.bf16.msra.mxu1 %v3324_v43 }
 0x458   : > { %2430 = vmatmul.mubr.bf16.vlgmr.msra.gmra.mxu1 %v3715_v61 }
 0x4d8   : > { %v2349_v52 = vpop.f32.mrf.mxu1  ;;  %v2390_v53 = vpop.f32.mrf.mxu0 }
 0x4d9   : > { %v2350_v54 = vadd.f32 %v2349_v52, %v1707_v48  ;;  %v2391_v55 = vadd.f32 %v2390_v53, %v1715_v49 }
 0x4da   : > { %v2351_v56 = vpop.f32.mrf.mxu1  ;;  %v2392_v57 = vpop.f32.mrf.mxu0 }
 0x4db   : > { %3329 = vtanh.f32 %v2350_v54  ;;  %v2352_v58 = vadd.f32 %v2351_v56, %v1711_v50  ;;  %v2393_v59 = vadd.f32 %v2392_v57, %v1719_v51 }
 0x4dc   : > { %3331 = vtanh.f32 %v2391_v55  ;;  %v2353_v60 = vpop.f32.mrf.mxu1  ;;  %v2394_v61 = vpop.f32.mrf.mxu0 }
 0x4dd   : > { %3333 = vtanh.f32 %v2352_v58 }
 0x4de   : > { %3335 = vtanh.f32 %v2393_v59  ;;  %v2354_v37 = vpop.f32.mrf.mxu1  ;;  %v2395_v62 = vpop.f32.mrf.mxu0 }
 0x4e8   : > { %v3330_v63 = vpop.eup %3329 }
 0x4e9   : > { %v3332_v0 = vpop.eup %3331  ;;  %2485 = vst [vmem:[#allocation10] sm:$0xff] %v3330_v63 }
 0x4ea   : > { %v3334_v47 = vpop.eup %3333  ;;  %2487 = vst [vmem:[#allocation10 + $0x10] sm:$0xff] %v3332_v0 }
 0x4eb   : > { %v3336_v1 = vpop.eup %3335  ;;  %2486 = vst [vmem:[#allocation10 + $0x8] sm:$0xff] %v3334_v47 }
 0x4ec   : > { %2488 = vst [vmem:[#allocation10 + $0x18] sm:$0xff] %v3336_v1 }
 0x4f8   : > { %v2905_v3 = vpop.f32.mrf.mxu0 }
 0x4fa   : > { %v2906_v5 = vpop.f32.mrf.mxu0 }
 0x4fb   : > { %v2907_v6 = vadd.f32 %v2906_v5, %v2905_v3 }
 0x4fc   : > { %v2908_v7 = vpop.f32.mrf.mxu0 }
 0x4fd   : > { %v2473_v8 = vadd.f32 %v2907_v6, %v1731_v4 }
 0x4fe   : > { %v2909_v9 = vpop.f32.mrf.mxu0 }
 0x4ff   : > { %3337 = vtanh.f32 %v2473_v8 }
 0x50c   : > { %v3338_v10 = vpop.eup %3337 }
 0x50d   : > { %2491 = vst [vmem:[#allocation10 + $0x30] sm:$0xff] %v3338_v10 }
 0x518   : > { %v2431_v15 = vpop.f32.mrf.mxu1 }
 0x519   : > { %v2432_v16 = vadd.f32 %v2431_v15, %v1723_v13 }
 0x51a   : > { %v2433_v17 = vpop.f32.mrf.mxu1 }
 0x51b   : > { %3339 = vtanh.f32 %v2432_v16  ;;  %v2434_v18 = vadd.f32 %v2433_v17, %v1727_v14 }
 0x51c   : > { %v2435_v19 = vpop.f32.mrf.mxu1 }
 0x51d   : > { %3341 = vtanh.f32 %v2434_v18 }
 0x51e   : > { %v2436_v20 = vpop.f32.mrf.mxu1 }
 0x528   : > { %v3340_v21 = vpop.eup %3339 }
 0x529   : > { %2489 = vst [vmem:[#allocation10 + $0x20] sm:$0xff] %v3340_v21 }
 0x52a   : > { %v3342_v22 = vpop.eup %3341 }
 0x52b   : > { %2490 = vst [vmem:[#allocation10 + $0x28] sm:$0xff] %v3342_v22 }
 0x52c PF: > { %p3734_p4 = scmp.eq.s32.totalorder %s2601_s27, 1  ;;  %s3465_s23 = smov [#allocation10]  }
 0x52d   : > { %s2508_s24 = sshll.u32 %s3465_s23, 4  ;;  %s2509_s24 = int_to_ptr.vmem [resolvable:$true] %s2508_s24 }
 0x52e   : > { %s3395_s30 = scalar_lea.vmem %s2509_s24, 896  ;;  %s3401_s8 = scalar_lea.vmem %s2509_s24, 1792 }
 0x52f   : > { %p3396_p6 = scmp.ne.s32.totalorder %s2509_s24, %s3395_s30  ;;  %p3402_p0 = scmp.lt.s32.totalorder %s2509_s24, %s2509_s24 }
 0x530   : > { %p3403_p1 = scmp.lt.s32.totalorder %s3401_s8, %s3395_s30 }
 0x531   : > { %p3397_p12 = pnand %p3396_p6, %p3734_p4 }
 0x532   : > { %p3404_p2 = por %p3403_p1, %p3402_p0 }
 0x533   : > { %p3398_p13 = pneg %p3397_p12 }
 0x535   : > { %p3405_p5 = pnand %p3404_p2, %p3398_p13 }
 0x537   : > { %3408 = shalt.err (!%p3405_p5)
}
 0x538   : > { %2932 = dma.vmem_to_hbm [thread:$0]  (%p3734_p4), %s2509_s24, 896, %s3764_s7, [#allocation7]  }
 0x539 PF: > { %p2951_p8 = scmp.ge.s32.totalorder %s3453_s26, 2  ;;  %p2952_p9 = scmp.eq.s32.totalorder %s2602_s28, 1 }
 0x53b   : > { %p2943_p11 = pnand %p2952_p9, %p2951_p8 }
 0x53d   : > { %p2944_p10 = pneg %p2943_p11 }
 0x53f   : > { %3440 = dma.done.wait (%p2944_p10), [#allocation7], 896  }
 0x540   : > { %3442 = vsyncadd (%p2944_p10), [#allocation7], 4294966400  ;;  %s22_s26 = sadd.s32 1, %s3453_s26   ;;  %s3769_s24 = smov %s3449_s25 }
 0x541   : > { %p19_p7 = scmp.ge.s32.totalorder %s22_s26, 4   ;;  %s3770_s25 = smov %s3772_s29 }
 0x543   :  { %21 = sbr.rel (!%p19_p7) target bundleno = 5 (0x5), region = 106 }
 0x548   :  { %2526 = vsyncpa [#allocation6], 1 }
 0x549   :  { %2528 = vsyncpa [#allocation6 + $0x1], 1 }
 0x54a   :  { %2529 = vsyncpa [#allocation9], 1 }
 0x54b   :  { %2530 = vsyncpa [#allocation7], 1 }
 0x54c   :  { %2532 = vsyncpa [#allocation7 + $0x1], 1 }

</bundles_post_ra>
